<compile_context>
chip_gen: v7x
topology: tpu7x:2x2x1
jax: 0.10.0
libtpu: 0.0.40
codegen_flags: <defaults>
</compile_context>

<pallas_src>
import functools

import jax
import jax.numpy as jnp
import numpy as np
from jax.experimental import pallas as pl
from jax.experimental.pallas import tpu as pltpu

LN_EPS = 1e-5  # PyTorch nn.LayerNorm default


def _layernorm(h, gamma, beta):
    # Centered two-pass formula (cancellation-safe vs. E[h^2]-E[h]^2).
    mu = jnp.mean(h, axis=-1, keepdims=True)
    c = h - mu
    var = jnp.mean(c * c, axis=-1, keepdims=True)
    return c * jax.lax.rsqrt(var + LN_EPS) * gamma + beta


def resid_block_kernel(x_ref, w1_ref, w2_ref, vecs_ref, o_ref):
    mm_dtype = w1_ref.dtype  # bf16 weights -> bf16 MXU inputs, f32 accumulate

    # Packed LN / bias rows: [b1, g1, be1, b2, g2, be2, pad, pad]  (8, D)
    b1 = vecs_ref[0:1, :]
    g1 = vecs_ref[1:2, :]
    be1 = vecs_ref[2:3, :]
    b2 = vecs_ref[3:4, :]
    g2 = vecs_ref[4:5, :]
    be2 = vecs_ref[5:6, :]

    # fc1 + ln1 + relu.  x is cast at the dot only; no f32 copy kept live.
    h = jnp.dot(x_ref[...].astype(mm_dtype), w1_ref[...],
                preferred_element_type=jnp.float32) + b1
    h = jnp.maximum(_layernorm(h, g1, be1), 0.0)

    # fc2 + ln2
    h = jnp.dot(h.astype(mm_dtype), w2_ref[...],
                preferred_element_type=jnp.float32) + b2
    h = _layernorm(h, g2, be2)

    # residual + relu: re-read x from the already-resident VMEM input block.
    o_ref[...] = jnp.maximum(x_ref[...].astype(jnp.float32) + h,
                             0.0).astype(o_ref.dtype)


def _tpu_generation_info():
    """(vmem_capacity_bytes, tensorcores_per_chip) with safe fallbacks."""
    vmem_cap = 64 * 1024 * 1024   # conservative default (v7x-sized)
    num_tc = 1
    try:
        kind = jax.devices()[0].device_kind.lower()
    except Exception:
        kind = ""
    if "v7" in kind:
        vmem_cap, num_tc = 64 * 1024 * 1024, 2
    elif "v5" in kind or "v6" in kind:
        vmem_cap, num_tc = 128 * 1024 * 1024, 1
    try:  # prefer the authoritative query when available on this jax build
        vmem_cap = int(pltpu.get_tpu_info().vmem_capacity_bytes)
    except Exception:
        pass
    return vmem_cap, num_tc


def _pick_block_b(B, D, num_tc, block_budget_bytes):
    """Largest bm (multiple of 8, divides B) fitting the double-buffered
    x/out block budget.  On multi-TC chips (v7x) prefer >= 2 steps per core so
    each core's block DMA stays pipelined; on single-TC chips grid=1 is fine
    (per-step overhead ~0.35us favors fewer, bigger steps)."""
    cap = min(B, 1024)
    per8 = 8 * D * 4 * 2 * 2  # x + out rows, f32, double-buffered
    cap = min(cap, max(8, (block_budget_bytes // per8) * 8))
    divisors = [bm for bm in range(8, cap + 1, 8) if B % bm == 0]
    if not divisors:
        # B not a multiple of 8 (or tiny): single, possibly masked, tile.
        return min(B, max(cap, 1))
    if num_tc > 1:
        per_core = [bm for bm in divisors if B // bm >= 2 * num_tc]
        if per_core:
            return max(per_core)
    return max(divisors)


def _resident_spec(shape, index_map):
    """BlockSpec for a VMEM-resident operand; single-buffered when the
    installed jax supports pipeline_mode.  Returns (spec, buffer_factor)."""
    if hasattr(pl, "Buffered"):
        try:
            return pl.BlockSpec(shape, index_map,
                                pipeline_mode=pl.Buffered(1)), 1
        except (TypeError, ValueError):
            pass
    return pl.BlockSpec(shape, index_map), 2


@functools.partial(jax.jit,
                   static_argnames=("block_b", "alias_input", "out_dtype"))
def resid_block(x, w1, b1, g1, be1, w2, b2, g2, be2, *,
                block_b=None, alias_input=False, out_dtype=None):
    B, D = x.shape
    out_dtype = x.dtype if out_dtype is None else jnp.dtype(out_dtype)
    x_itemsize = jnp.dtype(x.dtype).itemsize
    out_itemsize = jnp.dtype(out_dtype).itemsize
    w_itemsize = jnp.dtype(w1.dtype).itemsize

    vmem_cap, num_tc = _tpu_generation_info()
    # Explicit headroom for compiler scratch / semaphores; never claim it all.
    ceiling = max(vmem_cap - 6 * 1024 * 1024, 24 * 1024 * 1024)

    const = lambda i: (0, 0)
    mat_spec, w_buf_factor = _resident_spec((D, D), const)
    vec_spec, _ = _resident_spec((8, D), const)

    resident = w_buf_factor * 2 * D * D * w_itemsize + w_buf_factor * 8 * D * 4
    block_budget = max(ceiling - resident - (2 << 20), 2 * 1024 * 1024)
    bm = _pick_block_b(B, D, num_tc, block_budget) if block_b is None else block_b
    grid = (pl.cdiv(B, bm),)

    vmem_needed = (resident
                   + 2 * bm * D * (x_itemsize + out_itemsize)  # dbl-buffered x/out
                   + (2 << 20))
    vmem_limit = int(min(max(vmem_needed, 32 * 1024 * 1024), ceiling))

    cost = pl.CostEstimate(
        flops=4 * B * D * D + 20 * B * D,        # 2 matmuls + LN/elementwise
        transcendentals=2 * B,                    # 2 rsqrt per row
        bytes_accessed=(B * D * (x_itemsize + out_itemsize)
                        + 2 * D * D * w_itemsize + 8 * D * 4))

    x_spec = pl.BlockSpec((bm, D), lambda i: (i, 0))
    out_spec = pl.BlockSpec((bm, D), lambda i: (i, 0))

    # Pack the six (1, D) LN/bias rows into one (8, D) operand (2 pad rows):
    # one DMA descriptor instead of six padded sub-tile transfers.
    vecs = jnp.concatenate(
        [b1.astype(jnp.float32), g1.astype(jnp.float32), be1.astype(jnp.float32),
         b2.astype(jnp.float32), g2.astype(jnp.float32), be2.astype(jnp.float32),
         jnp.zeros((2, D), jnp.float32)], axis=0)

    aliases = {0: 0} if (alias_input and out_dtype == x.dtype) else {}

    return pl.pallas_call(
        resid_block_kernel,
        out_shape=jax.ShapeDtypeStruct((B, D), out_dtype),
        grid_spec=pltpu.PrefetchScalarGridSpec(
            num_scalar_prefetch=0,
            grid=grid,
            in_specs=[x_spec, mat_spec, mat_spec, vec_spec],
            out_specs=out_spec,
        ),
        compiler_params=pltpu.CompilerParams(
            dimension_semantics=("parallel",),
            vmem_limit_bytes=vmem_limit),
        cost_estimate=cost,
        input_output_aliases=aliases,
    )(x, w1, w2, vecs)


# ---------------- deterministic parameter construction (glue) ----------------

def _f(x):
    return jnp.sign(x) * jnp.sqrt(jnp.abs(x))


def make_noisy_linear_params(key, dim, sigma_init=0.5, weight_dtype=jnp.bfloat16):
    """Effective (training-mode) NoisyLinear weights as (W_T[in,out], b[1,out]).

    Build once and cache until noise is resampled — avoids re-doing the
    mu + sigma*eps / transpose / cast HBM round-trip on every forward call.
    """
    k_mu_w, k_mu_b, k_in, k_out = jax.random.split(key, 4)
    bound = 1.0 / np.sqrt(dim)
    mu_w = jax.random.uniform(k_mu_w, (dim, dim), jnp.float32, -bound, bound)  # (out, in)
    mu_b = jax.random.uniform(k_mu_b, (dim,), jnp.float32, -bound, bound)
    sigma_w = jnp.full((dim, dim), sigma_init * bound, jnp.float32)
    sigma_b = jnp.full((dim,), sigma_init * bound, jnp.float32)
    eps_in = _f(jax.random.normal(k_in, (dim,), jnp.float32))
    eps_out = _f(jax.random.normal(k_out, (dim,), jnp.float32))
    eps_w = jnp.outer(eps_out, eps_in)
    w = mu_w + sigma_w * eps_w                    # (out, in)
    b = mu_b + sigma_b * eps_out                  # (out,)
    # pre-transposed for x @ W, cast to MXU-native dtype; bias stays f32
    return w.T.astype(weight_dtype), b.reshape(1, dim)


def reference_forward(x, w1, b1, g1, be1, w2, b2, g2, be2):
    mm = w1.dtype
    h = jnp.dot(x.astype(mm), w1, preferred_element_type=jnp.float32) + b1
    h = jnp.maximum(_layernorm(h, g1, be1), 0.0)
    h = jnp.dot(h.astype(mm), w2, preferred_element_type=jnp.float32) + b2
    h = _layernorm(h, g2, be2)
    return jnp.maximum(x + h, 0.0)


if __name__ == "__main__":
    # dim=128 keeps the lane axis full (unmasked stores, full MXU columns);
    # B=256 -> grid=1 on v5e/v6e (largest tile, no per-step overhead) and
    # grid=4 x bm=64 on v7x (2 pipelined steps per TensorCore).
    B, D = 256, 128
    key = jax.random.PRNGKey(0)
    kx, k1, k2 = jax.random.split(key, 3)

    x = jax.random.normal(kx, (B, D), jnp.float32)
    w1, b1 = make_noisy_linear_params(k1, D)
    w2, b2 = make_noisy_linear_params(k2, D)
    g1 = jnp.ones((1, D), jnp.float32)
    be1 = jnp.zeros((1, D), jnp.float32)
    g2 = jnp.ones((1, D), jnp.float32)
    be2 = jnp.zeros((1, D), jnp.float32)

    out = resid_block(x, w1, b1, g1, be1, w2, b2, g2, be2)
    out = jax.block_until_ready(out)

    ref = reference_forward(x, w1, b1, g1, be1, w2, b2, g2, be2)
    np.testing.assert_allclose(np.asarray(out), np.asarray(ref),
                               rtol=1e-2, atol=1e-2)

    print("KERNEL_OK")
</pallas_src>

<mosaic_0001>
module attributes {stable_mosaic.version = 11 : i64} {
  func.func @resid_block_kernel(%arg0: i32, %arg1: memref<256x128xf32, #tpu.memory_space<vmem>>, %arg2: memref<128x128xbf16, #tpu.memory_space<vmem>>, %arg3: memref<128x128xbf16, #tpu.memory_space<vmem>>, %arg4: memref<8x128xf32, #tpu.memory_space<vmem>>, %arg5: memref<256x128xf32, #tpu.memory_space<vmem>>) attributes {dimension_semantics = [#tpu.dimension_semantics<parallel>], iteration_bounds = array<i64: 1>, scalar_prefetch = 0 : i64, scratch_operands = 0 : i64, tpu.core_type = #tpu.core_type<tc>, window_params = [{transform_indices = @transform_0, window_bounds = array<i64: 256, 128>}, {pipeline_mode = #tpu.pipeline_mode<synchronous>, transform_indices = @transform_1, window_bounds = array<i64: 128, 128>}, {pipeline_mode = #tpu.pipeline_mode<synchronous>, transform_indices = @transform_2, window_bounds = array<i64: 128, 128>}, {pipeline_mode = #tpu.pipeline_mode<synchronous>, transform_indices = @transform_3, window_bounds = array<i64: 8, 128>}, {transform_indices = @transform_4, window_bounds = array<i64: 256, 128>}]} {
    %c0 = arith.constant 0 : index
    %c0_0 = arith.constant 0 : index
    %0 = vector.load %arg4[%c0, %c0_0] : memref<8x128xf32, #tpu.memory_space<vmem>>, vector<1x128xf32>
    %c1 = arith.constant 1 : index
    %c0_1 = arith.constant 0 : index
    %1 = vector.load %arg4[%c1, %c0_1] : memref<8x128xf32, #tpu.memory_space<vmem>>, vector<1x128xf32>
    %c2 = arith.constant 2 : index
    %c0_2 = arith.constant 0 : index
    %2 = vector.load %arg4[%c2, %c0_2] : memref<8x128xf32, #tpu.memory_space<vmem>>, vector<1x128xf32>
    %c3 = arith.constant 3 : index
    %c0_3 = arith.constant 0 : index
    %3 = vector.load %arg4[%c3, %c0_3] : memref<8x128xf32, #tpu.memory_space<vmem>>, vector<1x128xf32>
    %c4 = arith.constant 4 : index
    %c0_4 = arith.constant 0 : index
    %4 = vector.load %arg4[%c4, %c0_4] : memref<8x128xf32, #tpu.memory_space<vmem>>, vector<1x128xf32>
    %c5 = arith.constant 5 : index
    %c0_5 = arith.constant 0 : index
    %5 = vector.load %arg4[%c5, %c0_5] : memref<8x128xf32, #tpu.memory_space<vmem>>, vector<1x128xf32>
    %c0_6 = arith.constant 0 : index
    %c0_7 = arith.constant 0 : index
    %6 = vector.load %arg1[%c0_6, %c0_7] : memref<256x128xf32, #tpu.memory_space<vmem>>, vector<256x128xf32>
    %7 = arith.truncf %6 : vector<256x128xf32> to vector<256x128xbf16>
    %c0_8 = arith.constant 0 : index
    %c0_9 = arith.constant 0 : index
    %8 = vector.load %arg2[%c0_8, %c0_9] : memref<128x128xbf16, #tpu.memory_space<vmem>>, vector<128x128xbf16>
    %cst = arith.constant dense<0.000000e+00> : vector<256x128xf32>
    %9 = tpu.matmul %7, %8, %cst {dimension_numbers = #tpu.dot_dimension_numbers<[1], [0], [0], [1], [0, 0, 1, 1], [], []>} : vector<256x128xbf16>, vector<128x128xbf16>, vector<256x128xf32> -> vector<256x128xf32>
    %10 = vector.broadcast %0 : vector<1x128xf32> to vector<256x128xf32>
    %11 = arith.addf %9, %10 : vector<256x128xf32>
    %cst_10 = arith.constant dense<0.000000e+00> : vector<256xf32>
    %12 = vector.multi_reduction <add>, %11, %cst_10 [1] : vector<256x128xf32> to vector<256xf32>
    %13 = vector.shape_cast %12 : vector<256xf32> to vector<256x1xf32>
    %cst_11 = arith.constant 1.280000e+02 : f32
    %14 = vector.broadcast %cst_11 : f32 to vector<256x1xf32>
    %15 = arith.divf %13, %14 : vector<256x1xf32>
    %16 = vector.broadcast %15 : vector<256x1xf32> to vector<256x128xf32>
    %17 = arith.subf %11, %16 : vector<256x128xf32>
    %18 = arith.mulf %17, %17 : vector<256x128xf32>
    %cst_12 = arith.constant dense<0.000000e+00> : vector<256xf32>
    %19 = vector.multi_reduction <add>, %18, %cst_12 [1] : vector<256x128xf32> to vector<256xf32>
    %20 = vector.shape_cast %19 : vector<256xf32> to vector<256x1xf32>
    %cst_13 = arith.constant 1.280000e+02 : f32
    %21 = vector.broadcast %cst_13 : f32 to vector<256x1xf32>
    %22 = arith.divf %20, %21 : vector<256x1xf32>
    %cst_14 = arith.constant 9.99999974E-6 : f32
    %23 = vector.broadcast %cst_14 : f32 to vector<256x1xf32>
    %24 = arith.addf %22, %23 : vector<256x1xf32>
    %25 = math.rsqrt %24 : vector<256x1xf32>
    %26 = vector.broadcast %25 : vector<256x1xf32> to vector<256x128xf32>
    %27 = arith.mulf %17, %26 : vector<256x128xf32>
    %28 = vector.broadcast %1 : vector<1x128xf32> to vector<256x128xf32>
    %29 = arith.mulf %27, %28 : vector<256x128xf32>
    %30 = vector.broadcast %2 : vector<1x128xf32> to vector<256x128xf32>
    %31 = arith.addf %29, %30 : vector<256x128xf32>
    %cst_15 = arith.constant 0.000000e+00 : f32
    %32 = vector.broadcast %cst_15 : f32 to vector<256x128xf32>
    %33 = arith.maximumf %31, %32 : vector<256x128xf32>
    %34 = arith.truncf %33 : vector<256x128xf32> to vector<256x128xbf16>
    %c0_16 = arith.constant 0 : index
    %c0_17 = arith.constant 0 : index
    %35 = vector.load %arg3[%c0_16, %c0_17] : memref<128x128xbf16, #tpu.memory_space<vmem>>, vector<128x128xbf16>
    %cst_18 = arith.constant dense<0.000000e+00> : vector<256x128xf32>
    %36 = tpu.matmul %34, %35, %cst_18 {dimension_numbers = #tpu.dot_dimension_numbers<[1], [0], [0], [1], [0, 0, 1, 1], [], []>} : vector<256x128xbf16>, vector<128x128xbf16>, vector<256x128xf32> -> vector<256x128xf32>
    %37 = vector.broadcast %3 : vector<1x128xf32> to vector<256x128xf32>
    %38 = arith.addf %36, %37 : vector<256x128xf32>
    %cst_19 = arith.constant dense<0.000000e+00> : vector<256xf32>
    %39 = vector.multi_reduction <add>, %38, %cst_19 [1] : vector<256x128xf32> to vector<256xf32>
    %40 = vector.shape_cast %39 : vector<256xf32> to vector<256x1xf32>
    %cst_20 = arith.constant 1.280000e+02 : f32
    %41 = vector.broadcast %cst_20 : f32 to vector<256x1xf32>
    %42 = arith.divf %40, %41 : vector<256x1xf32>
    %43 = vector.broadcast %42 : vector<256x1xf32> to vector<256x128xf32>
    %44 = arith.subf %38, %43 : vector<256x128xf32>
    %45 = arith.mulf %44, %44 : vector<256x128xf32>
    %cst_21 = arith.constant dense<0.000000e+00> : vector<256xf32>
    %46 = vector.multi_reduction <add>, %45, %cst_21 [1] : vector<256x128xf32> to vector<256xf32>
    %47 = vector.shape_cast %46 : vector<256xf32> to vector<256x1xf32>
    %cst_22 = arith.constant 1.280000e+02 : f32
    %48 = vector.broadcast %cst_22 : f32 to vector<256x1xf32>
    %49 = arith.divf %47, %48 : vector<256x1xf32>
    %cst_23 = arith.constant 9.99999974E-6 : f32
    %50 = vector.broadcast %cst_23 : f32 to vector<256x1xf32>
    %51 = arith.addf %49, %50 : vector<256x1xf32>
    %52 = math.rsqrt %51 : vector<256x1xf32>
    %53 = vector.broadcast %52 : vector<256x1xf32> to vector<256x128xf32>
    %54 = arith.mulf %44, %53 : vector<256x128xf32>
    %55 = vector.broadcast %4 : vector<1x128xf32> to vector<256x128xf32>
    %56 = arith.mulf %54, %55 : vector<256x128xf32>
    %57 = vector.broadcast %5 : vector<1x128xf32> to vector<256x128xf32>
    %58 = arith.addf %56, %57 : vector<256x128xf32>
    %c0_24 = arith.constant 0 : index
    %c0_25 = arith.constant 0 : index
    %59 = vector.load %arg1[%c0_24, %c0_25] : memref<256x128xf32, #tpu.memory_space<vmem>>, vector<256x128xf32>
    %60 = arith.addf %59, %58 : vector<256x128xf32>
    %cst_26 = arith.constant 0.000000e+00 : f32
    %61 = vector.broadcast %cst_26 : f32 to vector<256x128xf32>
    %62 = arith.maximumf %60, %61 : vector<256x128xf32>
    %c0_27 = arith.constant 0 : index
    %c0_28 = arith.constant 0 : index
    %63 = vector.load %arg5[%c0_27, %c0_28] : memref<256x128xf32, #tpu.memory_space<vmem>>, vector<256x128xf32>
    tpu.vector_store %arg5[%c0_27, %c0_28], %62 {strides = array<i32>} : memref<256x128xf32, #tpu.memory_space<vmem>>, vector<256x128xf32>,
    return
  }
  func.func @transform_0(%arg0: i32) -> (i32, i32) {
    %c0_i32 = arith.constant 0 : i32
    %c0_i32_0 = arith.constant 0 : i32
    return %arg0, %c0_i32 : i32, i32
  }
  func.func @transform_1(%arg0: i32) -> (i32, i32) {
    %c0_i32 = arith.constant 0 : i32
    %c0_i32_0 = arith.constant 0 : i32
    %c0_i32_1 = arith.constant 0 : i32
    return %c0_i32, %c0_i32_0 : i32, i32
  }
  func.func @transform_2(%arg0: i32) -> (i32, i32) {
    %c0_i32 = arith.constant 0 : i32
    %c0_i32_0 = arith.constant 0 : i32
    %c0_i32_1 = arith.constant 0 : i32
    return %c0_i32, %c0_i32_0 : i32, i32
  }
  func.func @transform_3(%arg0: i32) -> (i32, i32) {
    %c0_i32 = arith.constant 0 : i32
    %c0_i32_0 = arith.constant 0 : i32
    %c0_i32_1 = arith.constant 0 : i32
    return %c0_i32, %c0_i32_0 : i32, i32
  }
  func.func @transform_4(%arg0: i32) -> (i32, i32) {
    %c0_i32 = arith.constant 0 : i32
    %c0_i32_0 = arith.constant 0 : i32
    return %arg0, %c0_i32 : i32, i32
  }
}

</mosaic_0001>

<bundles_post_ra>
// kernel: resid_block.1
= control target key start
LH: loop header
LB: loop body
LE: loop exit
PB: predicated region body
PF: predicated region fallthrough
CT: control target
= control target key end

     0   :  { %9 = vsyncpa [#allocation3], 0  ;;  %s2918_s0 = inlined_call_operand.hbm [shape: f32[256,128], index: 0, kind: input, shape index: {}]   ;;  %s2919_s1 = inlined_call_operand.hbm [shape: bf16[128,128], index: 1, kind: input, shape index: {}]   ;;  %s2920_s2 = inlined_call_operand.hbm [shape: bf16[128,128], index: 2, kind: input, shape index: {}]   ;;  %s2921_s3 = inlined_call_operand.vmem [shape: f32[8,128], index: 3, kind: input, shape index: {}]   ;;  %s2922_s4 = inlined_call_operand.hbm [shape: f32[256,128], index: 4, kind: output, shape index: {}]  }
   0x1   :  { %10 = vsyncpa [#allocation6], 0 }
   0x2   :  { %11 = vsyncpa [#allocation4], 0  ;;  %s2027_s15 = smov [#allocation5]   ;;  %s1933_s19 = scalar_lea.hbm %s2919_s1, 1024 }
   0x3   :  { %s29_s16 = sshll.u32 %s2027_s15, 4  ;;  %p1934_p0 = scmp.ne.s32.totalorder %s2919_s1, %s1933_s19  ;;  %s30_s16 = int_to_ptr.vmem [resolvable:$true] %s29_s16 }
   0x4   :  { %p1937_p1 = scmp.lt.u32.totalorder %s1933_s19, %s2919_s1 }
   0x6   :  { %p1939_p2 = pnand %p1937_p1, %p1934_p0 }
   0x8   :  { %1942 = shalt.err (!%p1939_p2)
}
   0x9   :  { %s1943_s24 = scalar_lea.vmem %s30_s16, 1024  ;;  %p1948_p4 = scmp.lt.s32.totalorder %s30_s16, %s30_s16 }
   0xa   :  { %p1944_p3 = scmp.ne.s32.totalorder %s30_s16, %s1943_s24  ;;  %p1949_p5 = scmp.lt.s32.totalorder %s1943_s24, %s1943_s24 }
   0xc   :  { %p1950_p6 = por %p1949_p5, %p1948_p4 }
   0xe   :  { %p1951_p7 = pnand %p1950_p6, %p1944_p3 }
  0x10   :  { %1954 = shalt.err (!%p1951_p7)
}
  0x11   :  { %s2028_s25 = smov 64   ;;  %s2029_s26 = smov 4  }
  0x12   :  { %35 = dma.hbm_to_vmem [thread:$0]  %s2919_s1, 1024, %s30_s16, [#allocation6], %s2028_s25, %s2028_s25, %s2029_s26  }
  0x13   :  { %s2030_s29 = smov [#allocation2]   ;;  %s1955_s7 = scalar_lea.hbm %s2918_s0, 4096 }
  0x14   :  { %s17_s30 = sshll.u32 %s2030_s29, 4  ;;  %p1956_p8 = scmp.ne.s32.totalorder %s2918_s0, %s1955_s7  ;;  %s18_s30 = int_to_ptr.vmem [resolvable:$true] %s17_s30 }
  0x15   :  { %p1959_p9 = scmp.lt.u32.totalorder %s1955_s7, %s2918_s0 }
  0x17   :  { %p1961_p10 = pnand %p1959_p9, %p1956_p8 }
  0x19   :  { %1964 = shalt.err (!%p1961_p10)
}
  0x1a   :  { %s1965_s12 = scalar_lea.vmem %s18_s30, 4096  ;;  %p1970_p12 = scmp.lt.s32.totalorder %s18_s30, %s18_s30 }
  0x1b   :  { %p1966_p11 = scmp.ne.s32.totalorder %s18_s30, %s1965_s12  ;;  %p1971_p13 = scmp.lt.s32.totalorder %s1965_s12, %s1965_s12 }
  0x1d   :  { %p1972_p0 = por %p1971_p13, %p1970_p12 }
  0x1f   :  { %p1973_p1 = pnand %p1972_p0, %p1966_p11 }
  0x21   :  { %1976 = shalt.err (!%p1973_p1)
}
  0x22   :  { %s2031_s1 = smov 128   ;;  %s2032_s13 = smov 8  }
  0x23   :  { %23 = dma.hbm_to_vmem [thread:$0]  %s2918_s0, 4096, %s18_s30, [#allocation3], %s2031_s1, %s2031_s1, %s2032_s13  }
  0x24   :  { %s2033_s16 = smov [#allocation7]   ;;  %s1977_s20 = scalar_lea.hbm %s2920_s2, 1024 }
  0x25   :  { %s41_s17 = sshll.u32 %s2033_s16, 4  ;;  %p1978_p2 = scmp.ne.s32.totalorder %s2920_s2, %s1977_s20  ;;  %s42_s17 = int_to_ptr.vmem [resolvable:$true] %s41_s17 }
  0x26   :  { %p1981_p3 = scmp.lt.u32.totalorder %s1977_s20, %s2920_s2 }
  0x28   :  { %p1983_p4 = pnand %p1981_p3, %p1978_p2 }
  0x2a   :  { %1986 = shalt.err (!%p1983_p4)
}
  0x2b   :  { %s1987_s27 = scalar_lea.vmem %s42_s17, 1024  ;;  %p1992_p6 = scmp.lt.s32.totalorder %s42_s17, %s42_s17 }
  0x2c   :  { %p1988_p5 = scmp.ne.s32.totalorder %s42_s17, %s1987_s27  ;;  %p1993_p7 = scmp.lt.s32.totalorder %s1987_s27, %s1987_s27 }
  0x2e   :  { %p1994_p8 = por %p1993_p7, %p1992_p6 }
  0x30   :  { %p1995_p9 = pnand %p1994_p8, %p1988_p5 }
  0x32   :  { %1998 = shalt.err (!%p1995_p9)
}
  0x33   :  { %47 = dma.hbm_to_vmem [thread:$0]  %s2920_s2, 1024, %s42_s17, [#allocation6], %s2028_s25, %s2028_s25, %s2029_s26  }
  0x34   :  { %2021 = dma.done.wait [#allocation3], 4096  }
  0x35   :  { %2022 = vsyncadd [#allocation3], 4294963200 }
  0x36   :  { %2023 = dma.done.wait [#allocation6], 2048  }
  0x37   :  { %2024 = vsyncadd [#allocation6], 4294965248  ;;  %v1757_v0 = vld [vmem:[#allocation5] sm:$0xff]   ;;  %v1758_v1 = vld [vmem:[#allocation5 + $0x8] sm:$0xff]  }
  0x38   :  { %1653 = vmatprep.subr.bf16.mxu0 %v1757_v0  ;;  %v1759_v2 = vld [vmem:[#allocation5 + $0x10] sm:$0xff]   ;;  %v1760_v3 = vld [vmem:[#allocation5 + $0x18] sm:$0xff]   ;;  %v66_v4 = vld [vmem:[#allocation2] sm:$0xff] }
  0x39   :  { %1654 = vmatpush3.bf16.msra.mxu0 %v1757_v0  ;;  %v67_v5 = vld [vmem:[#allocation2 + $0x8] sm:$0xff]  ;;  %v1761_v7 = vld [vmem:[#allocation5 + $0x20] sm:$0xff]   ;;  %v1763_v9 = vld [vmem:[#allocation5 + $0x30] sm:$0xff]  }
  0x3a   :  { %1655 = vmatprep.subr.bf16.mxu0 %v1758_v1  ;;  %v98_v6 = vpack.c.bf16 %v67_v5, %v66_v4  ;;  %v1762_v8 = vld [vmem:[#allocation5 + $0x28] sm:$0xff]   ;;  %v1764_v10 = vld [vmem:[#allocation5 + $0x38] sm:$0xff]   ;;  %v68_v11 = vld [vmem:[#allocation2 + $0x10] sm:$0xff] }
  0x3b   :  { %v69_v12 = vld [vmem:[#allocation2 + $0x18] sm:$0xff]  ;;  %v70_v13 = vld [vmem:[#allocation2 + $0x20] sm:$0xff]  ;;  %v71_v14 = vld [vmem:[#allocation2 + $0x28] sm:$0xff] }
  0x3c   :  { %1669 = vmatprep.mubr.bf16.mxu0 %v98_v6  ;;  %v99_v15 = vpack.c.bf16 %v69_v12, %v68_v11  ;;  %v100_v16 = vpack.c.bf16 %v71_v14, %v70_v13  ;;  %v72_v17 = vld [vmem:[#allocation2 + $0x30] sm:$0xff]  ;;  %v73_v18 = vld [vmem:[#allocation2 + $0x38] sm:$0xff]  ;;  %v74_v19 = vld [vmem:[#allocation2 + $0x40] sm:$0xff] }
  0x3d   :  { %1656 = vmatpush3.bf16.msra.mxu0 %v1758_v1  ;;  %v75_v20 = vld [vmem:[#allocation2 + $0x48] sm:$0xff]  ;;  %v101_v21 = vpack.c.bf16 %v73_v18, %v72_v17  ;;  %v76_v23 = vld [vmem:[#allocation2 + $0x50] sm:$0xff]  ;;  %v77_v24 = vld [vmem:[#allocation2 + $0x58] sm:$0xff] }
  0x3e   :  { %1657 = vmatprep.subr.bf16.mxu0 %v1759_v2  ;;  %v102_v22 = vpack.c.bf16 %v75_v20, %v74_v19  ;;  %v78_v25 = vld [vmem:[#allocation2 + $0x60] sm:$0xff]  ;;  %v79_v26 = vld [vmem:[#allocation2 + $0x68] sm:$0xff]  ;;  %v103_v27 = vpack.c.bf16 %v77_v24, %v76_v23  ;;  %v80_v29 = vld [vmem:[#allocation2 + $0x70] sm:$0xff] }
  0x3f   :  { %v104_v28 = vpack.c.bf16 %v79_v26, %v78_v25  ;;  %v81_v30 = vld [vmem:[#allocation2 + $0x78] sm:$0xff]  ;;  %v82_v31 = vld [vmem:[#allocation2 + $0x80] sm:$0xff]  ;;  %v83_v32 = vld [vmem:[#allocation2 + $0x88] sm:$0xff] }
  0x40   :  { %v105_v33 = vpack.c.bf16 %v81_v30, %v80_v29  ;;  %v106_v34 = vpack.c.bf16 %v83_v32, %v82_v31  ;;  %v84_v35 = vld [vmem:[#allocation2 + $0x90] sm:$0xff]  ;;  %v85_v36 = vld [vmem:[#allocation2 + $0x98] sm:$0xff]  ;;  %v86_v37 = vld [vmem:[#allocation2 + $0xa0] sm:$0xff] }
  0x41   :  { %1658 = vmatpush3.bf16.msra.mxu0 %v1759_v2  ;;  %v87_v38 = vld [vmem:[#allocation2 + $0xa8] sm:$0xff]  ;;  %v107_v39 = vpack.c.bf16 %v85_v36, %v84_v35  ;;  %v88_v41 = vld [vmem:[#allocation2 + $0xb0] sm:$0xff]  ;;  %v89_v42 = vld [vmem:[#allocation2 + $0xb8] sm:$0xff] }
  0x42   :  { %1659 = vmatprep.subr.bf16.mxu0 %v1760_v3  ;;  %v108_v40 = vpack.c.bf16 %v87_v38, %v86_v37  ;;  %v90_v43 = vld [vmem:[#allocation2 + $0xc0] sm:$0xff]  ;;  %v91_v44 = vld [vmem:[#allocation2 + $0xc8] sm:$0xff]  ;;  %v109_v45 = vpack.c.bf16 %v89_v42, %v88_v41  ;;  %v92_v47 = vld [vmem:[#allocation2 + $0xd0] sm:$0xff] }
  0x43   :  { %v110_v46 = vpack.c.bf16 %v91_v44, %v90_v43  ;;  %v93_v48 = vld [vmem:[#allocation2 + $0xd8] sm:$0xff]  ;;  %v94_v49 = vld [vmem:[#allocation2 + $0xe0] sm:$0xff]  ;;  %v95_v50 = vld [vmem:[#allocation2 + $0xe8] sm:$0xff] }
  0x44   :  { %v111_v51 = vpack.c.bf16 %v93_v48, %v92_v47  ;;  %v112_v52 = vpack.c.bf16 %v95_v50, %v94_v49  ;;  %v96_v53 = vld [vmem:[#allocation2 + $0xf0] sm:$0xff]  ;;  %v97_v54 = vld [vmem:[#allocation2 + $0xf8] sm:$0xff]  ;;  %v2108_v56 = vld [vmem:[%s2921_s3] ss:$0 sm:$0xff] }
  0x45   :  { %1660 = vmatpush3.bf16.msra.mxu0 %v1760_v3  ;;  %v113_v55 = vpack.c.bf16 %v97_v54, %v96_v53 }
  0x46   :  { %1661 = vmatprep.subr.bf16.mxu0 %v1761_v7 }
  0x49   :  { %1662 = vmatpush3.bf16.msra.mxu0 %v1761_v7 }
  0x4a   :  { %1663 = vmatprep.subr.bf16.mxu0 %v1762_v8 }
  0x4d   :  { %1664 = vmatpush3.bf16.msra.mxu0 %v1762_v8 }
  0x4e   :  { %1665 = vmatprep.subr.bf16.mxu0 %v1763_v9 }
  0x51   :  { %1666 = vmatpush3.bf16.msra.mxu0 %v1763_v9 }
  0x52   :  { %1667 = vmatprep.subr.bf16.mxu0 %v1764_v10 }
  0x55   :  { %1668 = vmatpush3.bf16.msra.mxu0 %v1764_v10 }
  0x58   :  { %1670 = vmatmul.mubr.bf16.vlgmr.msra.gmra.mrb[0].mxu0 %v99_v15 }
  0x59   :  { %1673 = vmatprep.mubr.bf16.mxu0 %v100_v16 }
  0x60   :  { %1674 = vmatmul.mubr.bf16.gmra.mrb[4].mxu0 %v101_v21 }
  0x61   :  { %1677 = vmatprep.mubr.bf16.mxu0 %v102_v22 }
  0x68   :  { %1678 = vmatmul.mubr.bf16.gmra.mrb[8].mxu0 %v103_v27 }
  0x69   :  { %1681 = vmatprep.mubr.bf16.mxu0 %v104_v28 }
  0x70   :  { %1682 = vmatmul.mubr.bf16.gmra.mrb[12].mxu0 %v105_v33 }
  0x71   :  { %1685 = vmatprep.mubr.bf16.mxu0 %v106_v34 }
  0x78   :  { %1686 = vmatmul.mubr.bf16.gmra.mrb[16].mxu0 %v107_v39 }
  0x79   :  { %1689 = vmatprep.mubr.bf16.mxu0 %v108_v40 }
  0x80   :  { %1690 = vmatmul.mubr.bf16.gmra.mrb[20].mxu0 %v109_v45 }
  0x81   :  { %1693 = vmatprep.mubr.bf16.mxu0 %v110_v46 }
  0x88   :  { %1694 = vmatmul.mubr.bf16.gmra.mrb[24].mxu0 %v111_v51 }
  0x89   :  { %1697 = vmatprep.mubr.bf16.mxu0 %v112_v52 }
  0x90   :  { %1698 = vmatmul.mubr.bf16.gmra.mrb[28].mxu0 %v113_v55 }
 0x12b   :  { %v1671_v57 = vpop.f32.mrb[0].mxu0 }
 0x12c   :  { %v2111_v58 = vadd.f32 %v1671_v57, %v2108_v56  ;;  %v216_v59 = vpop.f32.mrb[1].mxu0 }
 0x12d   :  { %v2114_v60 = vadd.f32 %v2108_v56, %v216_v59  ;;  %v1672_v61 = vpop.f32.mrb[2].mxu0 }
 0x12e   :  { %347 = vadd.xlane.f32.xlu1 %v2111_v58  ;;  %v219_v62 = vpop.f32.mrb[3].mxu0  ;;  %v2119_v63 = vadd.f32 %v1672_v61, %v2108_v56 }
 0x12f   :  { %343 = vadd.xlane.f32.xlu0 %v2114_v60  ;;  %v2122_v0 = vadd.f32 %v2108_v56, %v219_v62 }
 0x132   :  { %349 = vadd.xlane.f32.xlu1 %v2119_v63 }
 0x133   :  { %v1675_v1 = vpop.f32.mrb[4].mxu0  ;;  %345 = vadd.xlane.f32.xlu0 %v2122_v0 }
 0x134   :  { %v232_v2 = vpop.f32.mrb[5].mxu0  ;;  %v2134_v7 = vadd.f32 %v1675_v1, %v2108_v56 }
 0x135   :  { %v2127_v3 = vadd.f32 %v2108_v56, %v232_v2  ;;  %v1676_v4 = vpop.f32.mrb[6].mxu0 }
 0x136   :  { %v235_v5 = vpop.f32.mrb[7].mxu0  ;;  %v2138_v8 = vadd.f32 %v1676_v4, %v2108_v56 }
 0x137   :  { %v2130_v6 = vadd.f32 %v2108_v56, %v235_v5  ;;  %351 = vadd.xlane.f32.xlu0 %v2127_v3 }
 0x139   :  { %353 = vadd.xlane.f32.xlu1 %v2130_v6 }
 0x13b   :  { %v1679_v9 = vpop.f32.mrb[8].mxu0  ;;  %355 = vadd.xlane.f32.xlu0 %v2134_v7 }
 0x13c   :  { %v248_v10 = vpop.f32.mrb[9].mxu0  ;;  %v2150_v15 = vadd.f32 %v1679_v9, %v2108_v56 }
 0x13d   :  { %v2142_v11 = vadd.f32 %v2108_v56, %v248_v10  ;;  %v1680_v12 = vpop.f32.mrb[10].mxu0  ;;  %357 = vadd.xlane.f32.xlu1 %v2138_v8 }
 0x13e   :  { %v251_v13 = vpop.f32.mrb[11].mxu0  ;;  %v2154_v16 = vadd.f32 %v1680_v12, %v2108_v56 }
 0x13f   :  { %v2146_v14 = vadd.f32 %v2108_v56, %v251_v13  ;;  %359 = vadd.xlane.f32.xlu0 %v2142_v11 }
 0x141   :  { %361 = vadd.xlane.f32.xlu1 %v2146_v14 }
 0x143   :  { %v1683_v17 = vpop.f32.mrb[12].mxu0  ;;  %363 = vadd.xlane.f32.xlu0 %v2150_v15 }
 0x144   :  { %v264_v18 = vpop.f32.mrb[13].mxu0  ;;  %v2166_v23 = vadd.f32 %v1683_v17, %v2108_v56 }
 0x145   :  { %v2158_v19 = vadd.f32 %v2108_v56, %v264_v18  ;;  %v1684_v20 = vpop.f32.mrb[14].mxu0  ;;  %365 = vadd.xlane.f32.xlu1 %v2154_v16 }
 0x146   :  { %v267_v21 = vpop.f32.mrb[15].mxu0  ;;  %v2170_v24 = vadd.f32 %v1684_v20, %v2108_v56 }
 0x147   :  { %v2162_v22 = vadd.f32 %v2108_v56, %v267_v21  ;;  %367 = vadd.xlane.f32.xlu0 %v2158_v19 }
 0x149   :  { %369 = vadd.xlane.f32.xlu1 %v2162_v22 }
 0x14b   :  { %v1687_v25 = vpop.f32.mrb[16].mxu0  ;;  %371 = vadd.xlane.f32.xlu0 %v2166_v23 }
 0x14c   :  { %v280_v26 = vpop.f32.mrb[17].mxu0  ;;  %v2182_v31 = vadd.f32 %v1687_v25, %v2108_v56 }
 0x14d   :  { %v2174_v27 = vadd.f32 %v2108_v56, %v280_v26  ;;  %v1688_v28 = vpop.f32.mrb[18].mxu0  ;;  %373 = vadd.xlane.f32.xlu1 %v2170_v24 }
 0x14e   :  { %v283_v29 = vpop.f32.mrb[19].mxu0  ;;  %v2186_v32 = vadd.f32 %v1688_v28, %v2108_v56 }
 0x14f   :  { %v2178_v30 = vadd.f32 %v2108_v56, %v283_v29  ;;  %375 = vadd.xlane.f32.xlu0 %v2174_v27 }
 0x151   :  { %377 = vadd.xlane.f32.xlu1 %v2178_v30 }
 0x153   :  { %v1691_v33 = vpop.f32.mrb[20].mxu0  ;;  %379 = vadd.xlane.f32.xlu0 %v2182_v31 }
 0x154   :  { %v296_v34 = vpop.f32.mrb[21].mxu0  ;;  %v2198_v39 = vadd.f32 %v1691_v33, %v2108_v56 }
 0x155   :  { %v2190_v35 = vadd.f32 %v2108_v56, %v296_v34  ;;  %v1692_v36 = vpop.f32.mrb[22].mxu0  ;;  %381 = vadd.xlane.f32.xlu1 %v2186_v32 }
 0x156   :  { %v299_v37 = vpop.f32.mrb[23].mxu0  ;;  %v2202_v40 = vadd.f32 %v1692_v36, %v2108_v56 }
 0x157   :  { %v2194_v38 = vadd.f32 %v2108_v56, %v299_v37  ;;  %383 = vadd.xlane.f32.xlu0 %v2190_v35 }
 0x159   :  { %385 = vadd.xlane.f32.xlu1 %v2194_v38 }
 0x15b   :  { %v1695_v41 = vpop.f32.mrb[24].mxu0  ;;  %387 = vadd.xlane.f32.xlu0 %v2198_v39 }
 0x15c   :  { %v312_v42 = vpop.f32.mrb[25].mxu0  ;;  %v2214_v47 = vadd.f32 %v1695_v41, %v2108_v56 }
 0x15d   :  { %v2206_v43 = vadd.f32 %v2108_v56, %v312_v42  ;;  %v1696_v44 = vpop.f32.mrb[26].mxu0  ;;  %389 = vadd.xlane.f32.xlu1 %v2202_v40 }
 0x15e   :  { %v315_v45 = vpop.f32.mrb[27].mxu0  ;;  %v2218_v48 = vadd.f32 %v1696_v44, %v2108_v56 }
 0x15f   :  { %v2210_v46 = vadd.f32 %v2108_v56, %v315_v45  ;;  %391 = vadd.xlane.f32.xlu0 %v2206_v43 }
 0x161   :  { %393 = vadd.xlane.f32.xlu1 %v2210_v46 }
 0x163   :  { %v1699_v49 = vpop.f32.mrb[28].mxu0  ;;  %395 = vadd.xlane.f32.xlu0 %v2214_v47 }
 0x164   :  { %v328_v50 = vpop.f32.mrb[29].mxu0  ;;  %v2230_v55 = vadd.f32 %v1699_v49, %v2108_v56 }
 0x165   :  { %v2222_v51 = vadd.f32 %v2108_v56, %v328_v50  ;;  %v1700_v52 = vpop.f32.mrb[30].mxu0  ;;  %397 = vadd.xlane.f32.xlu1 %v2218_v48 }
 0x166   :  { %v331_v53 = vpop.f32.mrb[31].mxu0  ;;  %v2234_v57 = vadd.f32 %v1700_v52, %v2108_v56  ;;  %v1765_v52 = vld [vmem:[#allocation7] sm:$0xff]  }
 0x167   :  { %v2226_v54 = vadd.f32 %v2108_v56, %v331_v53  ;;  %399 = vadd.xlane.f32.xlu0 %v2222_v51  ;;  %1701 = vmatprep.subr.bf16.mxu1 %v1765_v52 }
 0x168   :  { %1702 = vmatpush3.bf16.msra.mxu1 %v1765_v52 }
 0x169   :  { %401 = vadd.xlane.f32.xlu1 %v2226_v54 }
 0x16b   :  { %403 = vadd.xlane.f32.xlu0 %v2230_v55 }
 0x16d   :  { %405 = vadd.xlane.f32.xlu1 %v2234_v57 }
 0x1bb   :  { %v348_v59 = vpop.xlane.xlu1 %347 }
 0x1bc   :  { %v344_v61 = vpop.xlane.xlu0 %343  ;;  %v410_v62 = vmul.f32 0.0078125, %v348_v59 }
 0x1bd   :  { %v408_v1 = vmul.f32 0.0078125, %v344_v61 }
 0x1be   :  { %v2244_v56 = vsub.f32 %v2111_v58, %v410_v62 }
 0x1bf   :  { %v350_v2 = vpop.xlane.xlu1 %349  ;;  %v2239_v4 = vsub.f32 %v2114_v60, %v408_v1 }
 0x1c0   :  { %v346_v5 = vpop.xlane.xlu0 %345  ;;  %v411_v9 = vmul.f32 0.0078125, %v350_v2  ;;  %v474_v20 = vmul.f32 %v2244_v56, %v2244_v56 }
 0x1c1   :  { %v409_v10 = vmul.f32 0.0078125, %v346_v5  ;;  %v472_v12 = vmul.f32 %v2239_v4, %v2239_v4 }
 0x1c2   :  { %v2254_v21 = vsub.f32 %v2119_v63, %v411_v9 }
 0x1c3   :  { %504 = vadd.xlane.f32.xlu0 %v472_v12  ;;  %v2247_v13 = vsub.f32 %v2122_v0, %v409_v10  ;;  %v1766_v12 = vld [vmem:[#allocation7 + $0x8] sm:$0xff]  }
 0x1c4   :  { %v352_v17 = vpop.xlane.xlu0 %351  ;;  %v475_v29 = vmul.f32 %v2254_v21, %v2254_v21  ;;  %1703 = vmatprep.subr.bf16.mxu1 %v1766_v12 }
 0x1c5   :  { %v412_v18 = vmul.f32 0.0078125, %v352_v17  ;;  %v473_v60 = vmul.f32 %v2247_v13, %v2247_v13  ;;  %1704 = vmatpush3.bf16.msra.mxu1 %v1766_v12 }
 0x1c6   :  { %v354_v25 = vpop.xlane.xlu1 %353 }
 0x1c7   :  { %v413_v26 = vmul.f32 0.0078125, %v354_v25  ;;  %508 = vadd.xlane.f32.xlu0 %v474_v20  ;;  %506 = vadd.xlane.f32.xlu1 %v473_v60  ;;  %v2257_v58 = vsub.f32 %v2127_v3, %v412_v18 }
 0x1c8   :  { %v356_v0 = vpop.xlane.xlu0 %355 }
 0x1c9   :  { %v414_v28 = vmul.f32 0.0078125, %v356_v0  ;;  %v476_v33 = vmul.f32 %v2257_v58, %v2257_v58  ;;  %v2264_v34 = vsub.f32 %v2130_v6, %v413_v26  ;;  %v1767_v0 = vld [vmem:[#allocation7 + $0x10] sm:$0xff]  }
 0x1ca   :  { %v358_v63 = vpop.xlane.xlu1 %357  ;;  %1705 = vmatprep.subr.bf16.mxu1 %v1767_v0 }
 0x1cb   :  { %v415_v36 = vmul.f32 0.0078125, %v358_v63  ;;  %510 = vadd.xlane.f32.xlu1 %v475_v29  ;;  %512 = vadd.xlane.f32.xlu0 %v476_v33  ;;  %v2267_v37 = vsub.f32 %v2134_v7, %v414_v28  ;;  %v477_v42 = vmul.f32 %v2264_v34, %v2264_v34 }
 0x1cc   :  { %v360_v3 = vpop.xlane.xlu0 %359  ;;  %1706 = vmatpush3.bf16.msra.mxu1 %v1767_v0 }
 0x1cd   :  { %v416_v41 = vmul.f32 0.0078125, %v360_v3  ;;  %v478_v44 = vmul.f32 %v2267_v37, %v2267_v37  ;;  %v2274_v45 = vsub.f32 %v2138_v8, %v415_v36 }
 0x1ce   :  { %v362_v6 = vpop.xlane.xlu1 %361 }
 0x1cf   :  { %v417_v49 = vmul.f32 0.0078125, %v362_v6  ;;  %514 = vadd.xlane.f32.xlu1 %v477_v42  ;;  %516 = vadd.xlane.f32.xlu0 %v478_v44  ;;  %v2277_v50 = vsub.f32 %v2142_v11, %v416_v41  ;;  %v479_v59 = vmul.f32 %v2274_v45, %v2274_v45  ;;  %v1768_v41 = vld [vmem:[#allocation7 + $0x18] sm:$0xff]  }
 0x1d0   :  { %v364_v7 = vpop.xlane.xlu0 %363  ;;  %1707 = vmatprep.subr.bf16.mxu1 %v1768_v41 }
 0x1d1   :  { %v418_v53 = vmul.f32 0.0078125, %v364_v7  ;;  %v480_v61 = vmul.f32 %v2277_v50, %v2277_v50  ;;  %v2284_v62 = vsub.f32 %v2146_v14, %v417_v49  ;;  %1708 = vmatpush3.bf16.msra.mxu1 %v1768_v41 }
 0x1d2   :  { %v366_v8 = vpop.xlane.xlu1 %365 }
 0x1d3   :  { %v419_v1 = vmul.f32 0.0078125, %v366_v8  ;;  %518 = vadd.xlane.f32.xlu1 %v479_v59  ;;  %520 = vadd.xlane.f32.xlu0 %v480_v61  ;;  %v2287_v11 = vsub.f32 %v2150_v15, %v418_v53  ;;  %v481_v9 = vmul.f32 %v2284_v62, %v2284_v62  ;;  %v1769_v53 = vld [vmem:[#allocation7 + $0x20] sm:$0xff]  }
 0x1d4   :  { %v368_v2 = vpop.xlane.xlu0 %367  ;;  %1709 = vmatprep.subr.bf16.mxu1 %v1769_v53 }
 0x1d5   :  { %v420_v5 = vmul.f32 0.0078125, %v368_v2  ;;  %v482_v10 = vmul.f32 %v2287_v11, %v2287_v11  ;;  %v2294_v14 = vsub.f32 %v2154_v16, %v419_v1  ;;  %1710 = vmatpush3.bf16.msra.mxu1 %v1769_v53 }
 0x1d6   :  { %v370_v17 = vpop.xlane.xlu1 %369 }
 0x1d7   :  { %v421_v18 = vmul.f32 0.0078125, %v370_v17  ;;  %522 = vadd.xlane.f32.xlu1 %v481_v9  ;;  %524 = vadd.xlane.f32.xlu0 %v482_v10  ;;  %v2297_v15 = vsub.f32 %v2158_v19, %v420_v5  ;;  %v483_v25 = vmul.f32 %v2294_v14, %v2294_v14  ;;  %v1770_v9 = vld [vmem:[#allocation7 + $0x28] sm:$0xff]  }
 0x1d8   :  { %v372_v20 = vpop.xlane.xlu0 %371  ;;  %1711 = vmatprep.subr.bf16.mxu1 %v1770_v9 }
 0x1d9   :  { %v422_v60 = vmul.f32 0.0078125, %v372_v20  ;;  %v484_v26 = vmul.f32 %v2297_v15, %v2297_v15  ;;  %v2304_v16 = vsub.f32 %v2162_v22, %v421_v18  ;;  %1712 = vmatpush3.bf16.msra.mxu1 %v1770_v9 }
 0x1da   :  { %v374_v28 = vpop.xlane.xlu1 %373 }
 0x1db   :  { %v423_v29 = vmul.f32 0.0078125, %v374_v28  ;;  %526 = vadd.xlane.f32.xlu1 %v483_v25  ;;  %528 = vadd.xlane.f32.xlu0 %v484_v26  ;;  %v2307_v19 = vsub.f32 %v2166_v23, %v422_v60  ;;  %v485_v36 = vmul.f32 %v2304_v16, %v2304_v16  ;;  %v1771_v25 = vld [vmem:[#allocation7 + $0x30] sm:$0xff]  }
 0x1dc   :  { %v376_v33 = vpop.xlane.xlu0 %375  ;;  %1713 = vmatprep.subr.bf16.mxu1 %v1771_v25 }
 0x1dd   :  { %v424_v63 = vmul.f32 0.0078125, %v376_v33  ;;  %v486_v3 = vmul.f32 %v2307_v19, %v2307_v19  ;;  %v2314_v22 = vsub.f32 %v2170_v24, %v423_v29  ;;  %1714 = vmatpush3.bf16.msra.mxu1 %v1771_v25 }
 0x1de   :  { %v378_v42 = vpop.xlane.xlu1 %377 }
 0x1df   :  { %v425_v44 = vmul.f32 0.0078125, %v378_v42  ;;  %530 = vadd.xlane.f32.xlu1 %v485_v36  ;;  %532 = vadd.xlane.f32.xlu0 %v486_v3  ;;  %v2317_v23 = vsub.f32 %v2174_v27, %v424_v63  ;;  %v487_v7 = vmul.f32 %v2314_v22, %v2314_v22  ;;  %v1772_v36 = vld [vmem:[#allocation7 + $0x38] sm:$0xff]  }
 0x1e0   :  { %v380_v6 = vpop.xlane.xlu0 %379  ;;  %1715 = vmatprep.subr.bf16.mxu1 %v1772_v36 }
 0x1e1   :  { %v426_v49 = vmul.f32 0.0078125, %v380_v6  ;;  %v488_v52 = vmul.f32 %v2317_v23, %v2317_v23  ;;  %v2324_v24 = vsub.f32 %v2178_v30, %v425_v44  ;;  %1716 = vmatpush3.bf16.msra.mxu1 %v1772_v36 }
 0x1e2   :  { %v382_v59 = vpop.xlane.xlu1 %381 }
 0x1e3   :  { %v427_v61 = vmul.f32 0.0078125, %v382_v59  ;;  %534 = vadd.xlane.f32.xlu1 %v487_v7  ;;  %536 = vadd.xlane.f32.xlu0 %v488_v52  ;;  %v2327_v27 = vsub.f32 %v2182_v31, %v426_v49  ;;  %v489_v2 = vmul.f32 %v2324_v24, %v2324_v24 }
 0x1e4   :  { %v384_v8 = vpop.xlane.xlu0 %383 }
 0x1e5   :  { %v428_v1 = vmul.f32 0.0078125, %v384_v8  ;;  %v490_v5 = vmul.f32 %v2327_v27, %v2327_v27  ;;  %v2334_v30 = vsub.f32 %v2186_v32, %v427_v61 }
 0x1e6   :  { %v386_v10 = vpop.xlane.xlu1 %385 }
 0x1e7   :  { %v429_v12 = vmul.f32 0.0078125, %v386_v10  ;;  %538 = vadd.xlane.f32.xlu1 %v489_v2  ;;  %540 = vadd.xlane.f32.xlu0 %v490_v5  ;;  %v2337_v31 = vsub.f32 %v2190_v35, %v428_v1  ;;  %v491_v20 = vmul.f32 %v2334_v30, %v2334_v30 }
 0x1e8   :  { %v388_v17 = vpop.xlane.xlu0 %387 }
 0x1e9   :  { %v430_v18 = vmul.f32 0.0078125, %v388_v17  ;;  %v492_v60 = vmul.f32 %v2337_v31, %v2337_v31  ;;  %v2344_v32 = vsub.f32 %v2194_v38, %v429_v12 }
 0x1ea   :  { %v390_v26 = vpop.xlane.xlu1 %389 }
 0x1eb   :  { %v431_v0 = vmul.f32 0.0078125, %v390_v26  ;;  %542 = vadd.xlane.f32.xlu1 %v491_v20  ;;  %544 = vadd.xlane.f32.xlu0 %v492_v60  ;;  %v2347_v35 = vsub.f32 %v2198_v39, %v430_v18  ;;  %v493_v33 = vmul.f32 %v2344_v32, %v2344_v32 }
 0x1ec   :  { %v392_v28 = vpop.xlane.xlu0 %391 }
 0x1ed   :  { %v432_v29 = vmul.f32 0.0078125, %v392_v28  ;;  %v494_v63 = vmul.f32 %v2347_v35, %v2347_v35  ;;  %v2354_v38 = vsub.f32 %v2202_v40, %v431_v0 }
 0x1ee   :  { %v394_v3 = vpop.xlane.xlu1 %393 }
 0x1ef   :  { %v433_v41 = vmul.f32 0.0078125, %v394_v3  ;;  %546 = vadd.xlane.f32.xlu1 %v493_v33  ;;  %548 = vadd.xlane.f32.xlu0 %v494_v63  ;;  %v2357_v39 = vsub.f32 %v2206_v43, %v432_v29  ;;  %v495_v6 = vmul.f32 %v2354_v38, %v2354_v38 }
 0x1f0   :  { %v396_v42 = vpop.xlane.xlu0 %395 }
 0x1f1   :  { %v434_v44 = vmul.f32 0.0078125, %v396_v42  ;;  %v496_v49 = vmul.f32 %v2357_v39, %v2357_v39  ;;  %v2364_v40 = vsub.f32 %v2210_v46, %v433_v41 }
 0x1f2   :  { %v398_v7 = vpop.xlane.xlu1 %397 }
 0x1f3   :  { %v435_v52 = vmul.f32 0.0078125, %v398_v7  ;;  %550 = vadd.xlane.f32.xlu1 %v495_v6  ;;  %552 = vadd.xlane.f32.xlu0 %v496_v49  ;;  %v2367_v43 = vsub.f32 %v2214_v47, %v434_v44  ;;  %v497_v61 = vmul.f32 %v2364_v40, %v2364_v40 }
 0x1f4   :  { %v400_v53 = vpop.xlane.xlu0 %399 }
 0x1f5   :  { %v436_v59 = vmul.f32 0.0078125, %v400_v53  ;;  %v498_v8 = vmul.f32 %v2367_v43, %v2367_v43  ;;  %v2374_v1 = vsub.f32 %v2218_v48, %v435_v52 }
 0x1f6   :  { %v402_v46 = vpop.xlane.xlu1 %401 }
 0x1f7   :  { %v437_v2 = vmul.f32 0.0078125, %v402_v46  ;;  %554 = vadd.xlane.f32.xlu1 %v497_v61  ;;  %556 = vadd.xlane.f32.xlu0 %v498_v8  ;;  %v2377_v5 = vsub.f32 %v2222_v51, %v436_v59  ;;  %v499_v10 = vmul.f32 %v2374_v1, %v2374_v1 }
 0x1f8   :  { %v404_v47 = vpop.xlane.xlu0 %403 }
 0x1f9   :  { %v438_v9 = vmul.f32 0.0078125, %v404_v47  ;;  %v500_v12 = vmul.f32 %v2377_v5, %v2377_v5  ;;  %v2384_v17 = vsub.f32 %v2226_v54, %v437_v2  ;;  %v2401_v2 = vld [vmem:[%s2921_s3 + $0x1] ss:$0 sm:$0xff] }
 0x1fa   :  { %v406_v48 = vpop.xlane.xlu1 %405 }
 0x1fb   :  { %v2387_v18 = vsub.f32 %v2230_v55, %v438_v9  ;;  %v439_v20 = vmul.f32 0.0078125, %v406_v48  ;;  %558 = vadd.xlane.f32.xlu1 %v499_v10  ;;  %560 = vadd.xlane.f32.xlu0 %v500_v12  ;;  %v501_v60 = vmul.f32 %v2384_v17, %v2384_v17 }
 0x1fd   :  { %v2390_v51 = vsub.f32 %v2234_v57, %v439_v20  ;;  %v502_v25 = vmul.f32 %v2387_v18, %v2387_v18  ;;  %v2407_v20 = vld [vmem:[%s2921_s3 + $0x2] ss:$0 sm:$0xff] }
 0x1ff   :  { %562 = vadd.xlane.f32.xlu1 %v501_v60  ;;  %564 = vadd.xlane.f32.xlu0 %v502_v25  ;;  %v503_v54 = vmul.f32 %v2390_v51, %v2390_v51 }
 0x203   :  { %566 = vadd.xlane.f32.xlu1 %v503_v54 }
 0x250   :  { %v505_v55 = vpop.xlane.xlu0 %504 }
 0x251   :  { %v568_v26 = vmul.f32 0.0078125, %v505_v55 }
 0x253   :  { %v600_v0 = vadd.f32 1e-05, %v568_v26 }
 0x254   :  { %v507_v28 = vpop.xlane.xlu1 %506  ;;  %v509_v29 = vpop.xlane.xlu0 %508 }
 0x255   :  { %1773 = vrsqrt.f32 %v600_v0  ;;  %v569_v57 = vmul.f32 0.0078125, %v507_v28  ;;  %v570_v33 = vmul.f32 0.0078125, %v509_v29 }
 0x257   :  { %v601_v63 = vadd.f32 1e-05, %v569_v57  ;;  %v602_v36 = vadd.f32 1e-05, %v570_v33 }
 0x258   :  { %v511_v3 = vpop.xlane.xlu1 %510  ;;  %v513_v41 = vpop.xlane.xlu0 %512 }
 0x259   :  { %1775 = vrsqrt.f32 %v601_v63  ;;  %v571_v42 = vmul.f32 0.0078125, %v511_v3  ;;  %v572_v44 = vmul.f32 0.0078125, %v513_v41 }
 0x25a   :  { %1777 = vrsqrt.f32 %v602_v36 }
 0x25b   :  { %v603_v6 = vadd.f32 1e-05, %v571_v42  ;;  %v604_v49 = vadd.f32 1e-05, %v572_v44 }
 0x25c   :  { %v515_v7 = vpop.xlane.xlu1 %514  ;;  %v517_v52 = vpop.xlane.xlu0 %516 }
 0x25d   :  { %1779 = vrsqrt.f32 %v603_v6  ;;  %v573_v53 = vmul.f32 0.0078125, %v515_v7  ;;  %v574_v59 = vmul.f32 0.0078125, %v517_v52 }
 0x25e   :  { %1781 = vrsqrt.f32 %v604_v49 }
 0x25f   :  { %v1774_v61 = vpop.eup %1773  ;;  %v605_v8 = vadd.f32 1e-05, %v573_v53  ;;  %v606_v46 = vadd.f32 1e-05, %v574_v59 }
 0x260   :  { %v519_v47 = vpop.xlane.xlu1 %518  ;;  %v521_v9 = vpop.xlane.xlu0 %520  ;;  %v664_v10 = vmul.f32 %v1774_v61, %v2239_v4 }
 0x261   :  { %1783 = vrsqrt.f32 %v605_v8  ;;  %v575_v12 = vmul.f32 0.0078125, %v519_v47  ;;  %v576_v48 = vmul.f32 0.0078125, %v521_v9 }
 0x262   :  { %1785 = vrsqrt.f32 %v606_v46  ;;  %v700_v60 = vmul.f32 %v2401_v2, %v664_v10 }
 0x263   :  { %v1776_v25 = vpop.eup %1775  ;;  %v607_v54 = vadd.f32 1e-05, %v575_v12  ;;  %v608_v55 = vadd.f32 1e-05, %v576_v48 }
 0x264   :  { %v1778_v26 = vpop.eup %1777  ;;  %v523_v0 = vpop.xlane.xlu1 %522  ;;  %v665_v29 = vmul.f32 %v1776_v25, %v2247_v13  ;;  %v736_v4 = vadd.f32 %v2407_v20, %v700_v60 }
 0x265   :  { %v525_v28 = vpop.xlane.xlu0 %524  ;;  %1787 = vrsqrt.f32 %v607_v54  ;;  %v577_v57 = vmul.f32 0.0078125, %v523_v0  ;;  %v666_v63 = vmul.f32 %v1778_v26, %v2244_v56 }
 0x266   :  { %v578_v33 = vmul.f32 0.0078125, %v525_v28  ;;  %1789 = vrsqrt.f32 %v608_v55  ;;  %v701_v36 = vmul.f32 %v2401_v2, %v665_v29  ;;  %v768_v52 = vmax.f32 %v736_v4, 0.0 }
 0x267   :  { %v1780_v3 = vpop.eup %1779  ;;  %v609_v41 = vadd.f32 1e-05, %v577_v57  ;;  %v702_v44 = vmul.f32 %v2401_v2, %v666_v63 }
 0x268   :  { %v610_v42 = vadd.f32 1e-05, %v578_v33  ;;  %v1782_v6 = vpop.eup %1781  ;;  %v527_v49 = vpop.xlane.xlu1 %526  ;;  %v737_v13 = vadd.f32 %v2407_v20, %v701_v36  ;;  %v667_v53 = vmul.f32 %v1780_v3, %v2254_v21 }
 0x269   :  { %v529_v7 = vpop.xlane.xlu0 %528  ;;  %1791 = vrsqrt.f32 %v609_v41  ;;  %v579_v59 = vmul.f32 0.0078125, %v527_v49  ;;  %v738_v56 = vadd.f32 %v2407_v20, %v702_v44  ;;  %v668_v47 = vmul.f32 %v1782_v6, %v2257_v58 }
 0x26a   :  { %v580_v61 = vmul.f32 0.0078125, %v529_v7  ;;  %1793 = vrsqrt.f32 %v610_v42  ;;  %v769_v8 = vmax.f32 %v737_v13, 0.0  ;;  %v703_v46 = vmul.f32 %v2401_v2, %v667_v53 }
 0x26b   :  { %v1784_v9 = vpop.eup %1783  ;;  %v611_v10 = vadd.f32 1e-05, %v579_v59  ;;  %v770_v48 = vmax.f32 %v738_v56, 0.0  ;;  %v704_v0 = vmul.f32 %v2401_v2, %v668_v47 }
 0x26c   :  { %v612_v12 = vadd.f32 1e-05, %v580_v61  ;;  %v1786_v60 = vpop.eup %1785  ;;  %v531_v25 = vpop.xlane.xlu1 %530  ;;  %v800_v55 = vpack.c.bf16 %v769_v8, %v768_v52  ;;  %v739_v21 = vadd.f32 %v2407_v20, %v703_v46  ;;  %v669_v26 = vmul.f32 %v1784_v9, %v2264_v34 }
 0x26d   :  { %v533_v54 = vpop.xlane.xlu0 %532  ;;  %1795 = vrsqrt.f32 %v611_v10  ;;  %v581_v28 = vmul.f32 0.0078125, %v531_v25  ;;  %v670_v4 = vmul.f32 %v1786_v60, %v2267_v37  ;;  %v740_v33 = vadd.f32 %v2407_v20, %v704_v0 }
 0x26e   :  { %v582_v29 = vmul.f32 0.0078125, %v533_v54  ;;  %1797 = vrsqrt.f32 %v612_v12  ;;  %1717 = vmatprep.mubr.bf16.mxu1 %v800_v55  ;;  %v771_v58 = vmax.f32 %v739_v21, 0.0  ;;  %v705_v57 = vmul.f32 %v2401_v2, %v669_v26 }
 0x26f   :  { %v1788_v63 = vpop.eup %1787  ;;  %v613_v36 = vadd.f32 1e-05, %v581_v28  ;;  %v706_v41 = vmul.f32 %v2401_v2, %v670_v4  ;;  %v772_v7 = vmax.f32 %v740_v33, 0.0 }
 0x270   :  { %v614_v3 = vadd.f32 1e-05, %v582_v29  ;;  %v1790_v34 = vpop.eup %1789  ;;  %v535_v42 = vpop.xlane.xlu1 %534  ;;  %v801_v6 = vpack.c.bf16 %v771_v58, %v770_v48  ;;  %v741_v49 = vadd.f32 %v2407_v20, %v705_v57  ;;  %v671_v37 = vmul.f32 %v1788_v63, %v2274_v45 }
 0x271   :  { %v537_v44 = vpop.xlane.xlu0 %536  ;;  %1799 = vrsqrt.f32 %v613_v36  ;;  %v583_v13 = vmul.f32 0.0078125, %v535_v42  ;;  %v742_v53 = vadd.f32 %v2407_v20, %v706_v41  ;;  %v672_v56 = vmul.f32 %v1790_v34, %v2277_v50 }
 0x272   :  { %v584_v52 = vmul.f32 0.0078125, %v537_v44  ;;  %1801 = vrsqrt.f32 %v614_v3  ;;  %1718 = vmatmul.mubr.bf16.vlgmr.msra.gmra.mrb[0].mxu1 %v801_v6  ;;  %v773_v59 = vmax.f32 %v741_v49, 0.0  ;;  %v707_v61 = vmul.f32 %v2401_v2, %v671_v37 }
 0x273   :  { %v1792_v8 = vpop.eup %1791  ;;  %v615_v46 = vadd.f32 1e-05, %v583_v13  ;;  %v774_v9 = vmax.f32 %v742_v53, 0.0  ;;  %v708_v54 = vmul.f32 %v2401_v2, %v672_v56 }
 0x274   :  { %v616_v47 = vadd.f32 1e-05, %v584_v52  ;;  %v1794_v10 = vpop.eup %1793  ;;  %v539_v12 = vpop.xlane.xlu1 %538  ;;  %v802_v45 = vpack.c.bf16 %v773_v59, %v772_v7  ;;  %v743_v60 = vadd.f32 %v2407_v20, %v707_v61  ;;  %v673_v25 = vmul.f32 %v1792_v8, %v2284_v62 }
 0x275   :  { %v541_v48 = vpop.xlane.xlu0 %540  ;;  %1803 = vrsqrt.f32 %v615_v46  ;;  %v585_v55 = vmul.f32 0.0078125, %v539_v12  ;;  %v674_v26 = vmul.f32 %v1794_v10, %v2287_v11  ;;  %v744_v28 = vadd.f32 %v2407_v20, %v708_v54 }
 0x276   :  { %v586_v21 = vmul.f32 0.0078125, %v541_v48  ;;  %1805 = vrsqrt.f32 %v616_v47  ;;  %1721 = vmatprep.mubr.bf16.mxu1 %v802_v45  ;;  %v775_v50 = vmax.f32 %v743_v60, 0.0  ;;  %v709_v0 = vmul.f32 %v2401_v2, %v673_v25 }
 0x277   :  { %v1796_v29 = vpop.eup %1795  ;;  %v617_v4 = vadd.f32 1e-05, %v585_v55  ;;  %v710_v57 = vmul.f32 %v2401_v2, %v674_v26  ;;  %v776_v41 = vmax.f32 %v744_v28, 0.0 }
 0x278   :  { %v618_v58 = vadd.f32 1e-05, %v586_v21  ;;  %v1798_v62 = vpop.eup %1797  ;;  %v543_v33 = vpop.xlane.xlu1 %542  ;;  %v803_v36 = vpack.c.bf16 %v775_v50, %v774_v9  ;;  %v745_v3 = vadd.f32 %v2407_v20, %v709_v0  ;;  %v675_v11 = vmul.f32 %v1796_v29, %v2294_v14 }
 0x279   :  { %v545_v63 = vpop.xlane.xlu0 %544  ;;  %1807 = vrsqrt.f32 %v617_v4  ;;  %v587_v34 = vmul.f32 0.0078125, %v543_v33  ;;  %v746_v44 = vadd.f32 %v2407_v20, %v710_v57  ;;  %v676_v7 = vmul.f32 %v1798_v62, %v2297_v15 }
 0x27a   :  { %v588_v42 = vmul.f32 0.0078125, %v545_v63  ;;  %1809 = vrsqrt.f32 %v618_v58  ;;  %1722 = vmatmul.mubr.bf16.gmra.mrb[4].mxu1 %v803_v36  ;;  %v777_v6 = vmax.f32 %v745_v3, 0.0  ;;  %v711_v49 = vmul.f32 %v2401_v2, %v675_v11 }
 0x27b   :  { %v1800_v37 = vpop.eup %1799  ;;  %v619_v13 = vadd.f32 1e-05, %v587_v34  ;;  %v778_v53 = vmax.f32 %v746_v44, 0.0  ;;  %v712_v47 = vmul.f32 %v2401_v2, %v676_v7 }
 0x27c   :  { %v620_v52 = vadd.f32 1e-05, %v588_v42  ;;  %v1802_v59 = vpop.eup %1801  ;;  %v547_v61 = vpop.xlane.xlu1 %546  ;;  %v804_v14 = vpack.c.bf16 %v777_v6, %v776_v41  ;;  %v747_v8 = vadd.f32 %v2407_v20, %v711_v49  ;;  %v677_v46 = vmul.f32 %v1800_v37, %v2304_v16 }
 0x27d   :  { %v549_v56 = vpop.xlane.xlu0 %548  ;;  %1811 = vrsqrt.f32 %v619_v13  ;;  %v589_v9 = vmul.f32 0.0078125, %v547_v61  ;;  %v678_v12 = vmul.f32 %v1802_v59, %v2307_v19  ;;  %v748_v45 = vadd.f32 %v2407_v20, %v712_v47 }
 0x27e   :  { %v590_v10 = vmul.f32 0.0078125, %v549_v56  ;;  %1813 = vrsqrt.f32 %v620_v52  ;;  %1725 = vmatprep.mubr.bf16.mxu1 %v804_v14  ;;  %v779_v15 = vmax.f32 %v747_v8, 0.0  ;;  %v713_v48 = vmul.f32 %v2401_v2, %v677_v46 }
 0x27f   :  { %v1804_v60 = vpop.eup %1803  ;;  %v621_v25 = vadd.f32 1e-05, %v589_v9  ;;  %v714_v55 = vmul.f32 %v2401_v2, %v678_v12  ;;  %v780_v28 = vmax.f32 %v748_v45, 0.0 }
 0x280   :  { %v622_v54 = vadd.f32 1e-05, %v590_v10  ;;  %v1806_v16 = vpop.eup %1805  ;;  %v551_v21 = vpop.xlane.xlu1 %550  ;;  %v805_v50 = vpack.c.bf16 %v779_v15, %v778_v53  ;;  %v749_v0 = vadd.f32 %v2407_v20, %v713_v48  ;;  %v679_v19 = vmul.f32 %v1804_v60, %v2314_v22 }
 0x281   :  { %v553_v26 = vpop.xlane.xlu0 %552  ;;  %1815 = vrsqrt.f32 %v621_v25  ;;  %v591_v29 = vmul.f32 0.0078125, %v551_v21  ;;  %v750_v58 = vadd.f32 %v2407_v20, %v714_v55  ;;  %v680_v33 = vmul.f32 %v1806_v16, %v2317_v23 }
 0x282   :  { %v592_v4 = vmul.f32 0.0078125, %v553_v26  ;;  %1817 = vrsqrt.f32 %v622_v54  ;;  %1726 = vmatmul.mubr.bf16.gmra.mrb[8].mxu1 %v805_v50  ;;  %v781_v57 = vmax.f32 %v749_v0, 0.0  ;;  %v715_v62 = vmul.f32 %v2401_v2, %v679_v19 }
 0x283   :  { %v1808_v63 = vpop.eup %1807  ;;  %v623_v36 = vadd.f32 1e-05, %v591_v29  ;;  %v782_v41 = vmax.f32 %v750_v58, 0.0  ;;  %v716_v49 = vmul.f32 %v2401_v2, %v680_v33 }
 0x284   :  { %v624_v3 = vadd.f32 1e-05, %v592_v4  ;;  %v1810_v11 = vpop.eup %1809  ;;  %v555_v34 = vpop.xlane.xlu1 %554  ;;  %v806_v22 = vpack.c.bf16 %v781_v57, %v780_v28  ;;  %v751_v44 = vadd.f32 %v2407_v20, %v715_v62  ;;  %v681_v6 = vmul.f32 %v1808_v63, %v2324_v24 }
 0x285   :  { %v557_v42 = vpop.xlane.xlu0 %556  ;;  %1819 = vrsqrt.f32 %v623_v36  ;;  %v593_v7 = vmul.f32 0.0078125, %v555_v34  ;;  %v682_v13 = vmul.f32 %v1810_v11, %v2327_v27  ;;  %v752_v53 = vadd.f32 %v2407_v20, %v716_v49 }
 0x286   :  { %v594_v37 = vmul.f32 0.0078125, %v557_v42  ;;  %1821 = vrsqrt.f32 %v624_v3  ;;  %1729 = vmatprep.mubr.bf16.mxu1 %v806_v22  ;;  %v783_v23 = vmax.f32 %v751_v44, 0.0  ;;  %v717_v52 = vmul.f32 %v2401_v2, %v681_v6 }
 0x287   :  { %v1812_v59 = vpop.eup %1811  ;;  %v625_v61 = vadd.f32 1e-05, %v593_v7  ;;  %v718_v14 = vmul.f32 %v2401_v2, %v682_v13  ;;  %v784_v10 = vmax.f32 %v752_v53, 0.0 }
 0x288   :  { %v626_v56 = vadd.f32 1e-05, %v594_v37  ;;  %v1814_v24 = vpop.eup %1813  ;;  %v559_v8 = vpop.xlane.xlu1 %558  ;;  %v807_v47 = vpack.c.bf16 %v783_v23, %v782_v41  ;;  %v753_v9 = vadd.f32 %v2407_v20, %v717_v52  ;;  %v683_v27 = vmul.f32 %v1812_v59, %v2334_v30 }
 0x289   :  { %v561_v46 = vpop.xlane.xlu0 %560  ;;  %1823 = vrsqrt.f32 %v625_v61  ;;  %v595_v12 = vmul.f32 0.0078125, %v559_v8  ;;  %v754_v48 = vadd.f32 %v2407_v20, %v718_v14  ;;  %v684_v25 = vmul.f32 %v1814_v24, %v2337_v31 }
 0x28a   :  { %v596_v15 = vmul.f32 0.0078125, %v561_v46  ;;  %1825 = vrsqrt.f32 %v626_v56  ;;  %1730 = vmatmul.mubr.bf16.gmra.mrb[12].mxu1 %v807_v47  ;;  %v785_v45 = vmax.f32 %v753_v9, 0.0  ;;  %v719_v60 = vmul.f32 %v2401_v2, %v683_v27 }
 0x28b   :  { %v1816_v54 = vpop.eup %1815  ;;  %v627_v55 = vadd.f32 1e-05, %v595_v12  ;;  %v786_v21 = vmax.f32 %v754_v48, 0.0  ;;  %v720_v29 = vmul.f32 %v2401_v2, %v684_v25 }
 0x28c   :  { %v628_v16 = vadd.f32 1e-05, %v596_v15  ;;  %v1818_v26 = vpop.eup %1817  ;;  %v563_v50 = vpop.xlane.xlu1 %562  ;;  %v808_v30 = vpack.c.bf16 %v785_v45, %v784_v10  ;;  %v755_v28 = vadd.f32 %v2407_v20, %v719_v60  ;;  %v685_v19 = vmul.f32 %v1816_v54, %v2344_v32 }
 0x28d   :  { %v565_v0 = vpop.xlane.xlu0 %564  ;;  %1827 = vrsqrt.f32 %v627_v55  ;;  %v597_v4 = vmul.f32 0.0078125, %v563_v50  ;;  %v686_v57 = vmul.f32 %v1818_v26, %v2347_v35  ;;  %v756_v33 = vadd.f32 %v2407_v20, %v720_v29 }
 0x28e   :  { %v598_v58 = vmul.f32 0.0078125, %v565_v0  ;;  %1829 = vrsqrt.f32 %v628_v16  ;;  %1733 = vmatprep.mubr.bf16.mxu1 %v808_v30  ;;  %v787_v31 = vmax.f32 %v755_v28, 0.0  ;;  %v721_v62 = vmul.f32 %v2401_v2, %v685_v19 }
 0x28f   :  { %v1820_v63 = vpop.eup %1819  ;;  %v629_v36 = vadd.f32 1e-05, %v597_v4  ;;  %v722_v41 = vmul.f32 %v2401_v2, %v686_v57  ;;  %v788_v44 = vmax.f32 %v756_v33, 0.0 }
 0x290   :  { %v630_v3 = vadd.f32 1e-05, %v598_v58  ;;  %v1822_v32 = vpop.eup %1821  ;;  %v567_v11 = vpop.xlane.xlu1 %566  ;;  %v809_v34 = vpack.c.bf16 %v787_v31, %v786_v21  ;;  %v757_v42 = vadd.f32 %v2407_v20, %v721_v62  ;;  %v687_v22 = vmul.f32 %v1820_v63, %v2354_v38 }
 0x291   :  { %1831 = vrsqrt.f32 %v629_v36  ;;  %v599_v35 = vmul.f32 0.0078125, %v567_v11  ;;  %v688_v6 = vmul.f32 %v1822_v32, %v2357_v39  ;;  %v758_v37 = vadd.f32 %v2407_v20, %v722_v41 }
 0x292   :  { %1833 = vrsqrt.f32 %v630_v3  ;;  %1734 = vmatmul.mubr.bf16.gmra.mrb[16].mxu1 %v809_v34  ;;  %v789_v49 = vmax.f32 %v757_v42, 0.0  ;;  %v723_v7 = vmul.f32 %v2401_v2, %v687_v22  ;;  %v2507_v3 = vld [vmem:[%s2921_s3 + $0x3] ss:$0 sm:$0xff] }
 0x293   :  { %v1824_v13 = vpop.eup %1823  ;;  %v631_v23 = vadd.f32 1e-05, %v599_v35  ;;  %v724_v52 = vmul.f32 %v2401_v2, %v688_v6  ;;  %v790_v56 = vmax.f32 %v758_v37, 0.0 }
 0x294   :  { %v1826_v53 = vpop.eup %1825  ;;  %v810_v59 = vpack.c.bf16 %v789_v49, %v788_v44  ;;  %v759_v38 = vadd.f32 %v2407_v20, %v723_v7  ;;  %v689_v61 = vmul.f32 %v1824_v13, %v2364_v40 }
 0x295   :  { %1835 = vrsqrt.f32 %v631_v23  ;;  %v690_v39 = vmul.f32 %v1826_v53, %v2367_v43  ;;  %v760_v8 = vadd.f32 %v2407_v20, %v724_v52 }
 0x296   :  { %1737 = vmatprep.mubr.bf16.mxu1 %v810_v59  ;;  %v791_v14 = vmax.f32 %v759_v38, 0.0  ;;  %v725_v24 = vmul.f32 %v2401_v2, %v689_v61 }
 0x297   :  { %v1828_v46 = vpop.eup %1827  ;;  %v726_v47 = vmul.f32 %v2401_v2, %v690_v39  ;;  %v792_v43 = vmax.f32 %v760_v8, 0.0 }
 0x298   :  { %v1830_v9 = vpop.eup %1829  ;;  %v811_v10 = vpack.c.bf16 %v791_v14, %v790_v56  ;;  %v761_v27 = vadd.f32 %v2407_v20, %v725_v24  ;;  %v691_v12 = vmul.f32 %v1828_v46, %v2374_v1 }
 0x299   :  { %v692_v40 = vmul.f32 %v1830_v9, %v2377_v5  ;;  %v762_v45 = vadd.f32 %v2407_v20, %v726_v47 }
 0x29a   :  { %1738 = vmatmul.mubr.bf16.gmra.mrb[20].mxu1 %v811_v10  ;;  %v793_v15 = vmax.f32 %v761_v27, 0.0  ;;  %v727_v48 = vmul.f32 %v2401_v2, %v691_v12 }
 0x29b   :  { %v1832_v60 = vpop.eup %1831  ;;  %v728_v25 = vmul.f32 %v2401_v2, %v692_v40  ;;  %v794_v5 = vmax.f32 %v762_v45, 0.0 }
 0x29c   :  { %v1834_v54 = vpop.eup %1833  ;;  %v812_v55 = vpack.c.bf16 %v793_v15, %v792_v43  ;;  %v763_v16 = vadd.f32 %v2407_v20, %v727_v48  ;;  %v693_v21 = vmul.f32 %v1832_v60, %v2384_v17 }
 0x29d   :  { %v694_v1 = vmul.f32 %v1834_v54, %v2387_v18  ;;  %v764_v0 = vadd.f32 %v2407_v20, %v728_v25 }
 0x29e   :  { %1741 = vmatprep.mubr.bf16.mxu1 %v812_v55  ;;  %v795_v26 = vmax.f32 %v763_v16, 0.0  ;;  %v729_v50 = vmul.f32 %v2401_v2, %v693_v21 }
 0x29f   :  { %v1836_v30 = vpop.eup %1835  ;;  %v730_v28 = vmul.f32 %v2401_v2, %v694_v1  ;;  %v796_v58 = vmax.f32 %v764_v0, 0.0 }
 0x2a0   :  { %v813_v19 = vpack.c.bf16 %v795_v26, %v794_v5  ;;  %v765_v29 = vadd.f32 %v2407_v20, %v729_v50  ;;  %v695_v4 = vmul.f32 %v1836_v30, %v2390_v51 }
 0x2a1   :  { %v766_v57 = vadd.f32 %v2407_v20, %v730_v28 }
 0x2a2   :  { %1742 = vmatmul.mubr.bf16.gmra.mrb[24].mxu1 %v813_v19  ;;  %v797_v17 = vmax.f32 %v765_v29, 0.0  ;;  %v731_v18 = vmul.f32 %v2401_v2, %v695_v4 }
 0x2a3   :  { %v798_v33 = vmax.f32 %v766_v57, 0.0 }
 0x2a4   :  { %v814_v31 = vpack.c.bf16 %v797_v17, %v796_v58  ;;  %v767_v62 = vadd.f32 %v2407_v20, %v731_v18 }
 0x2a6   :  { %1745 = vmatprep.mubr.bf16.mxu1 %v814_v31  ;;  %v799_v63 = vmax.f32 %v767_v62, 0.0 }
 0x2a8   :  { %v815_v36 = vpack.c.bf16 %v799_v63, %v798_v33 }
 0x2aa   :  { %1746 = vmatmul.mubr.bf16.gmra.mrb[28].mxu1 %v815_v36 }
 0x345   :  { %v1719_v51 = vpop.f32.mrb[0].mxu1 }
 0x346   :  { %v2510_v41 = vadd.f32 %v1719_v51, %v2507_v3  ;;  %v918_v2 = vpop.f32.mrb[1].mxu1 }
 0x347   :  { %v1720_v32 = vpop.f32.mrb[2].mxu1  ;;  %v2517_v34 = vadd.f32 %v2507_v3, %v918_v2 }
 0x348   :  { %v2513_v11 = vadd.f32 %v1720_v32, %v2507_v3  ;;  %1049 = vadd.xlane.f32.xlu0 %v2510_v41  ;;  %v921_v20 = vpop.f32.mrb[3].mxu1 }
 0x349   :  { %v2521_v42 = vadd.f32 %v2507_v3, %v921_v20 }
 0x34a   :  { %1051 = vadd.xlane.f32.xlu1 %v2513_v11 }
 0x34c   :  { %1045 = vadd.xlane.f32.xlu0 %v2517_v34 }
 0x34d   :  { %v1723_v22 = vpop.f32.mrb[4].mxu1 }
 0x34e   :  { %v2525_v35 = vadd.f32 %v1723_v22, %v2507_v3  ;;  %v934_v44 = vpop.f32.mrb[5].mxu1  ;;  %1047 = vadd.xlane.f32.xlu1 %v2521_v42 }
 0x34f   :  { %v1724_v6 = vpop.f32.mrb[6].mxu1  ;;  %v2533_v37 = vadd.f32 %v2507_v3, %v934_v44 }
 0x350   :  { %v2529_v49 = vadd.f32 %v1724_v6, %v2507_v3  ;;  %v937_v7 = vpop.f32.mrb[7].mxu1  ;;  %1057 = vadd.xlane.f32.xlu0 %v2525_v35 }
 0x351   :  { %v2537_v13 = vadd.f32 %v2507_v3, %v937_v7 }
 0x352   :  { %1059 = vadd.xlane.f32.xlu1 %v2529_v49 }
 0x354   :  { %1053 = vadd.xlane.f32.xlu0 %v2533_v37 }
 0x355   :  { %v1727_v23 = vpop.f32.mrb[8].mxu1 }
 0x356   :  { %v2541_v52 = vadd.f32 %v1727_v23, %v2507_v3  ;;  %v950_v53 = vpop.f32.mrb[9].mxu1  ;;  %1055 = vadd.xlane.f32.xlu1 %v2537_v13 }
 0x357   :  { %v1728_v59 = vpop.f32.mrb[10].mxu1  ;;  %v2549_v39 = vadd.f32 %v2507_v3, %v950_v53 }
 0x358   :  { %v2545_v38 = vadd.f32 %v1728_v59, %v2507_v3  ;;  %v953_v61 = vpop.f32.mrb[11].mxu1  ;;  %1065 = vadd.xlane.f32.xlu0 %v2541_v52 }
 0x359   :  { %v2553_v56 = vadd.f32 %v2507_v3, %v953_v61 }
 0x35a   :  { %1067 = vadd.xlane.f32.xlu1 %v2545_v38 }
 0x35c   :  { %1061 = vadd.xlane.f32.xlu0 %v2549_v39 }
 0x35d   :  { %v1731_v14 = vpop.f32.mrb[12].mxu1 }
 0x35e   :  { %v2557_v24 = vadd.f32 %v1731_v14, %v2507_v3  ;;  %v966_v8 = vpop.f32.mrb[13].mxu1  ;;  %1063 = vadd.xlane.f32.xlu1 %v2553_v56 }
 0x35f   :  { %v1732_v46 = vpop.f32.mrb[14].mxu1  ;;  %v2565_v10 = vadd.f32 %v2507_v3, %v966_v8 }
 0x360   :  { %v2561_v47 = vadd.f32 %v1732_v46, %v2507_v3  ;;  %v969_v9 = vpop.f32.mrb[15].mxu1  ;;  %1073 = vadd.xlane.f32.xlu0 %v2557_v24 }
 0x361   :  { %v2569_v27 = vadd.f32 %v2507_v3, %v969_v9 }
 0x362   :  { %1075 = vadd.xlane.f32.xlu1 %v2561_v47 }
 0x364   :  { %1069 = vadd.xlane.f32.xlu0 %v2565_v10 }
 0x365   :  { %v1735_v12 = vpop.f32.mrb[16].mxu1 }
 0x366   :  { %v2573_v40 = vadd.f32 %v1735_v12, %v2507_v3  ;;  %v982_v43 = vpop.f32.mrb[17].mxu1  ;;  %1071 = vadd.xlane.f32.xlu1 %v2569_v27 }
 0x367   :  { %v1736_v15 = vpop.f32.mrb[18].mxu1  ;;  %v2581_v60 = vadd.f32 %v2507_v3, %v982_v43 }
 0x368   :  { %v2577_v48 = vadd.f32 %v1736_v15, %v2507_v3  ;;  %v985_v45 = vpop.f32.mrb[19].mxu1  ;;  %1081 = vadd.xlane.f32.xlu0 %v2573_v40 }
 0x369   :  { %v2585_v25 = vadd.f32 %v2507_v3, %v985_v45 }
 0x36a   :  { %1083 = vadd.xlane.f32.xlu1 %v2577_v48 }
 0x36c   :  { %1077 = vadd.xlane.f32.xlu0 %v2581_v60 }
 0x36d   :  { %v1739_v54 = vpop.f32.mrb[20].mxu1 }
 0x36e   :  { %v2589_v55 = vadd.f32 %v1739_v54, %v2507_v3  ;;  %v998_v16 = vpop.f32.mrb[21].mxu1  ;;  %1079 = vadd.xlane.f32.xlu1 %v2585_v25 }
 0x36f   :  { %v1740_v21 = vpop.f32.mrb[22].mxu1  ;;  %v2597_v26 = vadd.f32 %v2507_v3, %v998_v16 }
 0x370   :  { %v2593_v1 = vadd.f32 %v1740_v21, %v2507_v3  ;;  %v1001_v5 = vpop.f32.mrb[23].mxu1  ;;  %1089 = vadd.xlane.f32.xlu0 %v2589_v55 }
 0x371   :  { %v2601_v50 = vadd.f32 %v2507_v3, %v1001_v5 }
 0x372   :  { %1091 = vadd.xlane.f32.xlu1 %v2593_v1 }
 0x374   :  { %1085 = vadd.xlane.f32.xlu0 %v2597_v26 }
 0x375   :  { %v1743_v0 = vpop.f32.mrb[24].mxu1 }
 0x376   :  { %v2605_v30 = vadd.f32 %v1743_v0, %v2507_v3  ;;  %v1014_v28 = vpop.f32.mrb[25].mxu1  ;;  %1087 = vadd.xlane.f32.xlu1 %v2601_v50 }
 0x377   :  { %v1744_v19 = vpop.f32.mrb[26].mxu1  ;;  %v2613_v58 = vadd.f32 %v2507_v3, %v1014_v28 }
 0x378   :  { %v2609_v29 = vadd.f32 %v1744_v19, %v2507_v3  ;;  %v1017_v4 = vpop.f32.mrb[27].mxu1  ;;  %1097 = vadd.xlane.f32.xlu0 %v2605_v30 }
 0x379   :  { %v2617_v17 = vadd.f32 %v2507_v3, %v1017_v4 }
 0x37a   :  { %1099 = vadd.xlane.f32.xlu1 %v2609_v29 }
 0x37c   :  { %1093 = vadd.xlane.f32.xlu0 %v2613_v58 }
 0x37d   :  { %v1747_v18 = vpop.f32.mrb[28].mxu1 }
 0x37e   :  { %v1030_v57 = vpop.f32.mrb[29].mxu1  ;;  %1095 = vadd.xlane.f32.xlu1 %v2617_v17  ;;  %v2629_v36 = vadd.f32 %v1747_v18, %v2507_v3 }
 0x37f   :  { %v2622_v31 = vadd.f32 %v2507_v3, %v1030_v57  ;;  %v1748_v62 = vpop.f32.mrb[30].mxu1 }
 0x380   :  { %v1033_v33 = vpop.f32.mrb[31].mxu1  ;;  %v2633_v51 = vadd.f32 %v1748_v62, %v2507_v3 }
 0x381   :  { %v2625_v63 = vadd.f32 %v2507_v3, %v1033_v33  ;;  %1101 = vadd.xlane.f32.xlu0 %v2622_v31 }
 0x383   :  { %1103 = vadd.xlane.f32.xlu1 %v2625_v63 }
 0x385   :  { %1105 = vadd.xlane.f32.xlu0 %v2629_v36 }
 0x387   :  { %1107 = vadd.xlane.f32.xlu1 %v2633_v51 }
 0x3d5   :  { %v1050_v2 = vpop.xlane.xlu0 %1049 }
 0x3d6   :  { %v1111_v32 = vmul.f32 0.0078125, %v1050_v2 }
 0x3d7   :  { %v1052_v20 = vpop.xlane.xlu1 %1051 }
 0x3d8   :  { %v2638_v22 = vsub.f32 %v2510_v41, %v1111_v32  ;;  %v1112_v44 = vmul.f32 0.0078125, %v1052_v20 }
 0x3d9   :  { %v1046_v6 = vpop.xlane.xlu0 %1045 }
 0x3da   :  { %v2641_v7 = vsub.f32 %v2513_v11, %v1112_v44  ;;  %v1109_v23 = vmul.f32 0.0078125, %v1046_v6  ;;  %v1175_v3 = vmul.f32 %v2638_v22, %v2638_v22 }
 0x3db   :  { %v1048_v53 = vpop.xlane.xlu1 %1047 }
 0x3dc   :  { %v2646_v59 = vsub.f32 %v2517_v34, %v1109_v23  ;;  %v1110_v61 = vmul.f32 0.0078125, %v1048_v53  ;;  %1209 = vadd.xlane.f32.xlu0 %v1175_v3  ;;  %v1176_v14 = vmul.f32 %v2641_v7, %v2641_v7 }
 0x3dd   :  { %v1058_v41 = vpop.xlane.xlu0 %1057 }
 0x3de   :  { %v2651_v8 = vsub.f32 %v2521_v42, %v1110_v61  ;;  %v1115_v46 = vmul.f32 0.0078125, %v1058_v41  ;;  %1211 = vadd.xlane.f32.xlu1 %v1176_v14  ;;  %v1173_v11 = vmul.f32 %v2646_v59, %v2646_v59 }
 0x3df   :  { %v1060_v9 = vpop.xlane.xlu1 %1059 }
 0x3e0   :  { %v2656_v12 = vsub.f32 %v2525_v35, %v1115_v46  ;;  %v1116_v34 = vmul.f32 0.0078125, %v1060_v9  ;;  %1205 = vadd.xlane.f32.xlu0 %v1173_v11  ;;  %v1174_v43 = vmul.f32 %v2651_v8, %v2651_v8 }
 0x3e1   :  { %v1054_v15 = vpop.xlane.xlu0 %1053 }
 0x3e2   :  { %v2661_v45 = vsub.f32 %v2529_v49, %v1116_v34  ;;  %v1113_v42 = vmul.f32 0.0078125, %v1054_v15  ;;  %1207 = vadd.xlane.f32.xlu1 %v1174_v43  ;;  %v1179_v54 = vmul.f32 %v2656_v12, %v2656_v12 }
 0x3e3   :  { %v1056_v16 = vpop.xlane.xlu1 %1055 }
 0x3e4   :  { %v2666_v21 = vsub.f32 %v2533_v37, %v1113_v42  ;;  %v1114_v35 = vmul.f32 0.0078125, %v1056_v16  ;;  %1217 = vadd.xlane.f32.xlu0 %v1179_v54  ;;  %v1180_v5 = vmul.f32 %v2661_v45, %v2661_v45 }
 0x3e5   :  { %v1066_v0 = vpop.xlane.xlu0 %1065 }
 0x3e6   :  { %v2671_v28 = vsub.f32 %v2537_v13, %v1114_v35  ;;  %v1119_v49 = vmul.f32 0.0078125, %v1066_v0  ;;  %1219 = vadd.xlane.f32.xlu1 %v1180_v5  ;;  %v1177_v19 = vmul.f32 %v2666_v21, %v2666_v21 }
 0x3e7   :  { %v1068_v4 = vpop.xlane.xlu1 %1067 }
 0x3e8   :  { %v2676_v18 = vsub.f32 %v2541_v52, %v1119_v49  ;;  %v1120_v37 = vmul.f32 0.0078125, %v1068_v4  ;;  %1213 = vadd.xlane.f32.xlu0 %v1177_v19  ;;  %v1178_v57 = vmul.f32 %v2671_v28, %v2671_v28 }
 0x3e9   :  { %v1062_v62 = vpop.xlane.xlu0 %1061 }
 0x3ea   :  { %v2681_v33 = vsub.f32 %v2545_v38, %v1120_v37  ;;  %v1117_v13 = vmul.f32 0.0078125, %v1062_v62  ;;  %1215 = vadd.xlane.f32.xlu1 %v1178_v57  ;;  %v1183_v2 = vmul.f32 %v2676_v18, %v2676_v18 }
 0x3eb   :  { %v1064_v32 = vpop.xlane.xlu1 %1063 }
 0x3ec   :  { %v2686_v20 = vsub.f32 %v2549_v39, %v1117_v13  ;;  %v1118_v52 = vmul.f32 0.0078125, %v1064_v32  ;;  %1225 = vadd.xlane.f32.xlu0 %v1183_v2  ;;  %v1184_v44 = vmul.f32 %v2681_v33, %v2681_v33 }
 0x3ed   :  { %v1074_v6 = vpop.xlane.xlu0 %1073 }
 0x3ee   :  { %v2691_v23 = vsub.f32 %v2553_v56, %v1118_v52  ;;  %v1123_v38 = vmul.f32 0.0078125, %v1074_v6  ;;  %1227 = vadd.xlane.f32.xlu1 %v1184_v44  ;;  %v1181_v3 = vmul.f32 %v2686_v20, %v2686_v20 }
 0x3ef   :  { %v1076_v53 = vpop.xlane.xlu1 %1075 }
 0x3f0   :  { %v2696_v61 = vsub.f32 %v2557_v24, %v1123_v38  ;;  %v1124_v39 = vmul.f32 0.0078125, %v1076_v53  ;;  %1221 = vadd.xlane.f32.xlu0 %v1181_v3  ;;  %v1182_v14 = vmul.f32 %v2691_v23, %v2691_v23 }
 0x3f1   :  { %v1070_v41 = vpop.xlane.xlu0 %1069 }
 0x3f2   :  { %v2701_v46 = vsub.f32 %v2561_v47, %v1124_v39  ;;  %v1121_v56 = vmul.f32 0.0078125, %v1070_v41  ;;  %1223 = vadd.xlane.f32.xlu1 %v1182_v14  ;;  %v1187_v11 = vmul.f32 %v2696_v61, %v2696_v61 }
 0x3f3   :  { %v1072_v9 = vpop.xlane.xlu1 %1071 }
 0x3f4   :  { %v2706_v34 = vsub.f32 %v2565_v10, %v1121_v56  ;;  %v1122_v24 = vmul.f32 0.0078125, %v1072_v9  ;;  %1233 = vadd.xlane.f32.xlu0 %v1187_v11  ;;  %v1188_v43 = vmul.f32 %v2701_v46, %v2701_v46 }
 0x3f5   :  { %v1082_v15 = vpop.xlane.xlu0 %1081 }
 0x3f6   :  { %v2711_v42 = vsub.f32 %v2569_v27, %v1122_v24  ;;  %v1127_v47 = vmul.f32 0.0078125, %v1082_v15  ;;  %1235 = vadd.xlane.f32.xlu1 %v1188_v43  ;;  %v1185_v54 = vmul.f32 %v2706_v34, %v2706_v34 }
 0x3f7   :  { %v1084_v16 = vpop.xlane.xlu1 %1083 }
 0x3f8   :  { %v2716_v35 = vsub.f32 %v2573_v40, %v1127_v47  ;;  %v1128_v10 = vmul.f32 0.0078125, %v1084_v16  ;;  %1229 = vadd.xlane.f32.xlu0 %v1185_v54  ;;  %v1186_v5 = vmul.f32 %v2711_v42, %v2711_v42 }
 0x3f9   :  { %v1078_v0 = vpop.xlane.xlu0 %1077 }
 0x3fa   :  { %v2721_v49 = vsub.f32 %v2577_v48, %v1128_v10  ;;  %v1125_v27 = vmul.f32 0.0078125, %v1078_v0  ;;  %1231 = vadd.xlane.f32.xlu1 %v1186_v5  ;;  %v1191_v19 = vmul.f32 %v2716_v35, %v2716_v35 }
 0x3fb   :  { %v1080_v4 = vpop.xlane.xlu1 %1079 }
 0x3fc   :  { %v2726_v37 = vsub.f32 %v2581_v60, %v1125_v27  ;;  %v1126_v40 = vmul.f32 0.0078125, %v1080_v4  ;;  %1241 = vadd.xlane.f32.xlu0 %v1191_v19  ;;  %v1192_v57 = vmul.f32 %v2721_v49, %v2721_v49 }
 0x3fd   :  { %v1090_v62 = vpop.xlane.xlu0 %1089 }
 0x3fe   :  { %v2731_v13 = vsub.f32 %v2585_v25, %v1126_v40  ;;  %v1131_v48 = vmul.f32 0.0078125, %v1090_v62  ;;  %1243 = vadd.xlane.f32.xlu1 %v1192_v57  ;;  %v1189_v2 = vmul.f32 %v2726_v37, %v2726_v37 }
 0x3ff   :  { %v1092_v32 = vpop.xlane.xlu1 %1091 }
 0x400   :  { %v2736_v52 = vsub.f32 %v2589_v55, %v1131_v48  ;;  %v1132_v60 = vmul.f32 0.0078125, %v1092_v32  ;;  %1237 = vadd.xlane.f32.xlu0 %v1189_v2  ;;  %v1190_v44 = vmul.f32 %v2731_v13, %v2731_v13 }
 0x401   :  { %v1086_v6 = vpop.xlane.xlu0 %1085 }
 0x402   :  { %v2741_v38 = vsub.f32 %v2593_v1, %v1132_v60  ;;  %v1129_v25 = vmul.f32 0.0078125, %v1086_v6  ;;  %1239 = vadd.xlane.f32.xlu1 %v1190_v44  ;;  %v1195_v3 = vmul.f32 %v2736_v52, %v2736_v52 }
 0x403   :  { %v1088_v53 = vpop.xlane.xlu1 %1087 }
 0x404   :  { %v2746_v39 = vsub.f32 %v2597_v26, %v1129_v25  ;;  %v1130_v55 = vmul.f32 0.0078125, %v1088_v53  ;;  %1249 = vadd.xlane.f32.xlu0 %v1195_v3  ;;  %v1196_v14 = vmul.f32 %v2741_v38, %v2741_v38 }
 0x405   :  { %v1098_v41 = vpop.xlane.xlu0 %1097 }
 0x406   :  { %v2751_v56 = vsub.f32 %v2601_v50, %v1130_v55  ;;  %v1135_v1 = vmul.f32 0.0078125, %v1098_v41  ;;  %1251 = vadd.xlane.f32.xlu1 %v1196_v14  ;;  %v1193_v11 = vmul.f32 %v2746_v39, %v2746_v39 }
 0x407   :  { %v1100_v9 = vpop.xlane.xlu1 %1099 }
 0x408   :  { %v2756_v24 = vsub.f32 %v2605_v30, %v1135_v1  ;;  %v1136_v26 = vmul.f32 0.0078125, %v1100_v9  ;;  %1245 = vadd.xlane.f32.xlu0 %v1193_v11  ;;  %v1194_v43 = vmul.f32 %v2751_v56, %v2751_v56 }
 0x409   :  { %v1094_v15 = vpop.xlane.xlu0 %1093 }
 0x40a   :  { %v2761_v47 = vsub.f32 %v2609_v29, %v1136_v26  ;;  %v1133_v50 = vmul.f32 0.0078125, %v1094_v15  ;;  %1247 = vadd.xlane.f32.xlu1 %v1194_v43  ;;  %v1199_v54 = vmul.f32 %v2756_v24, %v2756_v24 }
 0x40b   :  { %v1096_v16 = vpop.xlane.xlu1 %1095 }
 0x40c   :  { %v2766_v10 = vsub.f32 %v2613_v58, %v1133_v50  ;;  %v1134_v30 = vmul.f32 0.0078125, %v1096_v16  ;;  %1257 = vadd.xlane.f32.xlu0 %v1199_v54  ;;  %v1200_v5 = vmul.f32 %v2761_v47, %v2761_v47 }
 0x40e   :  { %v2771_v0 = vsub.f32 %v2617_v17, %v1134_v30  ;;  %1259 = vadd.xlane.f32.xlu1 %v1200_v5  ;;  %v1102_v29 = vpop.xlane.xlu0 %1101  ;;  %v1197_v27 = vmul.f32 %v2766_v10, %v2766_v10 }
 0x40f   :  { %v1137_v19 = vmul.f32 0.0078125, %v1102_v29 }
 0x410   :  { %v1104_v4 = vpop.xlane.xlu1 %1103  ;;  %1253 = vadd.xlane.f32.xlu0 %v1197_v27  ;;  %v1198_v58 = vmul.f32 %v2771_v0, %v2771_v0 }
 0x411   :  { %v2778_v40 = vsub.f32 %v2622_v31, %v1137_v19  ;;  %v1138_v57 = vmul.f32 0.0078125, %v1104_v4 }
 0x412   :  { %1255 = vadd.xlane.f32.xlu1 %v1198_v58  ;;  %v1106_v62 = vpop.xlane.xlu0 %1105  ;;  %v2800_v58 = vld [vmem:[%s2921_s3 + $0x4] ss:$0 sm:$0xff] }
 0x413   :  { %v2781_v17 = vsub.f32 %v2625_v63, %v1138_v57  ;;  %v1139_v48 = vmul.f32 0.0078125, %v1106_v62  ;;  %v1201_v2 = vmul.f32 %v2778_v40, %v2778_v40 }
 0x414   :  { %v1108_v32 = vpop.xlane.xlu1 %1107 }
 0x415   :  { %v2786_v60 = vsub.f32 %v2629_v36, %v1139_v48  ;;  %v1140_v44 = vmul.f32 0.0078125, %v1108_v32  ;;  %1261 = vadd.xlane.f32.xlu0 %v1201_v2  ;;  %v1202_v31 = vmul.f32 %v2781_v17, %v2781_v17 }
 0x417   :  { %v2791_v6 = vsub.f32 %v2633_v51, %v1140_v44  ;;  %1263 = vadd.xlane.f32.xlu1 %v1202_v31  ;;  %v1203_v63 = vmul.f32 %v2786_v60, %v2786_v60  ;;  %v2806_v44 = vld [vmem:[%s2921_s3 + $0x5] ss:$0 sm:$0xff]  ;;  %s2034_s3 = smov [#allocation8]  }
 0x418   :  { %s1570_s12 = sshll.u32 %s2034_s3, 4  ;;  %s1571_s12 = int_to_ptr.vmem [resolvable:$true] %s1570_s12 }
 0x419   :  { %1265 = vadd.xlane.f32.xlu0 %v1203_v63  ;;  %v1204_v25 = vmul.f32 %v2791_v6, %v2791_v6  ;;  %s1999_s14 = scalar_lea.vmem %s1571_s12, 4096  ;;  %p2004_p11 = scmp.lt.s32.totalorder %s1571_s12, %s1571_s12 }
 0x41a   :  { %p2000_p10 = scmp.ne.s32.totalorder %s1571_s12, %s1999_s14  ;;  %p2005_p12 = scmp.lt.s32.totalorder %s1999_s14, %s1999_s14 }
 0x41b   :  { %1267 = vadd.xlane.f32.xlu1 %v1204_v25 }
 0x41c   :  { %p2006_p13 = por %p2005_p12, %p2004_p11 }
 0x41e   :  { %p2007_p0 = pnand %p2006_p13, %p2000_p10 }
 0x469   :  { %v1210_v3 = vpop.xlane.xlu0 %1209 }
 0x46a   :  { %v1271_v36 = vmul.f32 0.0078125, %v1210_v3 }
 0x46b   :  { %v1212_v53 = vpop.xlane.xlu1 %1211 }
 0x46c   :  { %v1303_v55 = vadd.f32 1e-05, %v1271_v36  ;;  %v1272_v14 = vmul.f32 0.0078125, %v1212_v53 }
 0x46d   :  { %v1206_v41 = vpop.xlane.xlu0 %1205 }
 0x46e   :  { %1837 = vrsqrt.f32 %v1303_v55  ;;  %v1304_v1 = vadd.f32 1e-05, %v1272_v14  ;;  %v1269_v11 = vmul.f32 0.0078125, %v1206_v41 }
 0x46f   :  { %v1208_v51 = vpop.xlane.xlu1 %1207 }
 0x470   :  { %1839 = vrsqrt.f32 %v1304_v1  ;;  %v1301_v9 = vadd.f32 1e-05, %v1269_v11  ;;  %v1270_v26 = vmul.f32 0.0078125, %v1208_v51 }
 0x471   :  { %v1218_v43 = vpop.xlane.xlu0 %1217 }
 0x472   :  { %1841 = vrsqrt.f32 %v1301_v9  ;;  %v1302_v15 = vadd.f32 1e-05, %v1270_v26  ;;  %v1275_v50 = vmul.f32 0.0078125, %v1218_v43  ;;  %v1901_v43 = vld [vmem:[#allocation2 + $0x10] sm:$0xff] }
 0x473   :  { %v1220_v54 = vpop.xlane.xlu1 %1219 }
 0x474   :  { %1843 = vrsqrt.f32 %v1302_v15  ;;  %v1307_v16 = vadd.f32 1e-05, %v1275_v50  ;;  %v1276_v30 = vmul.f32 0.0078125, %v1220_v54 }
 0x475   :  { %v1214_v5 = vpop.xlane.xlu0 %1213 }
 0x476   :  { %1845 = vrsqrt.f32 %v1307_v16  ;;  %v1308_v29 = vadd.f32 1e-05, %v1276_v30  ;;  %v1273_v27 = vmul.f32 0.0078125, %v1214_v5 }
 0x477   :  { %v1216_v19 = vpop.xlane.xlu1 %1215 }
 0x478   :  { %v1838_v4 = vpop.eup %1837  ;;  %1847 = vrsqrt.f32 %v1308_v29  ;;  %v1305_v57 = vadd.f32 1e-05, %v1273_v27  ;;  %v1274_v62 = vmul.f32 0.0078125, %v1216_v19 }
 0x479   :  { %v1367_v48 = vmul.f32 %v1838_v4, %v2638_v22  ;;  %v1226_v2 = vpop.xlane.xlu0 %1225 }
 0x47a   :  { %v1840_v32 = vpop.eup %1839  ;;  %1849 = vrsqrt.f32 %v1305_v57  ;;  %v1306_v31 = vadd.f32 1e-05, %v1274_v62  ;;  %v1279_v63 = vmul.f32 0.0078125, %v1226_v2 }
 0x47b   :  { %v1403_v25 = vmul.f32 %v2800_v58, %v1367_v48  ;;  %v1368_v3 = vmul.f32 %v1840_v32, %v2641_v7  ;;  %v1228_v36 = vpop.xlane.xlu1 %1227 }
 0x47c   :  { %v1842_v53 = vpop.eup %1841  ;;  %1851 = vrsqrt.f32 %v1306_v31  ;;  %v1311_v55 = vadd.f32 1e-05, %v1279_v63  ;;  %v1280_v14 = vmul.f32 0.0078125, %v1228_v36  ;;  %v1903_v63 = vld [vmem:[#allocation2] sm:$0xff] }
 0x47d   :  { %v1439_v22 = vadd.f32 %v2806_v44, %v1403_v25  ;;  %v1404_v41 = vmul.f32 %v2800_v58, %v1368_v3  ;;  %v1365_v1 = vmul.f32 %v1842_v53, %v2646_v59  ;;  %v1222_v11 = vpop.xlane.xlu0 %1221  ;;  %v1902_v59 = vld [vmem:[#allocation2 + $0x18] sm:$0xff] }
 0x47e   :  { %v1844_v51 = vpop.eup %1843  ;;  %1853 = vrsqrt.f32 %v1311_v55  ;;  %v1312_v9 = vadd.f32 1e-05, %v1280_v14  ;;  %v1277_v26 = vmul.f32 0.0078125, %v1222_v11 }
 0x47f   :  { %v1471_v15 = vadd.f32 %v1901_v43, %v1439_v22  ;;  %v1440_v7 = vadd.f32 %v2806_v44, %v1404_v41  ;;  %v1401_v50 = vmul.f32 %v2800_v58, %v1365_v1  ;;  %v1366_v54 = vmul.f32 %v1844_v51, %v2651_v8  ;;  %v1224_v16 = vpop.xlane.xlu1 %1223  ;;  %v1904_v1 = vld [vmem:[#allocation2 + $0x8] sm:$0xff] }
 0x480   :  { %v1846_v30 = vpop.eup %1845  ;;  %1855 = vrsqrt.f32 %v1312_v9  ;;  %v1309_v5 = vadd.f32 1e-05, %v1277_v26  ;;  %v1278_v29 = vmul.f32 0.0078125, %v1224_v16 }
 0x481   :  { %v1503_v27 = vmax.f32 %v1471_v15, 0.0  ;;  %v1472_v19 = vadd.f32 %v1902_v59, %v1440_v7  ;;  %v1437_v4 = vadd.f32 %v2806_v44, %v1401_v50  ;;  %v1402_v57 = vmul.f32 %v2800_v58, %v1366_v54  ;;  %v1234_v62 = vpop.xlane.xlu0 %1233 }
 0x482   :  { %v1848_v48 = vpop.eup %1847  ;;  %v1371_v2 = vmul.f32 %v1846_v30, %v2656_v12  ;;  %1857 = vrsqrt.f32 %v1309_v5  ;;  %v1310_v32 = vadd.f32 1e-05, %v1278_v29  ;;  %v1283_v31 = vmul.f32 0.0078125, %v1234_v62 }
 0x483   :  { %1535 = vst [vmem:[#allocation8 + $0x10] sm:$0xff] %v1503_v27  ;;  %v1504_v8 = vmax.f32 %v1472_v19, 0.0  ;;  %v1469_v25 = vadd.f32 %v1903_v63, %v1437_v4  ;;  %v1438_v3 = vadd.f32 %v2806_v44, %v1402_v57  ;;  %v1372_v36 = vmul.f32 %v1848_v48, %v2661_v45  ;;  %v1236_v53 = vpop.xlane.xlu1 %1235  ;;  %v1905_v27 = vld [vmem:[#allocation2 + $0x30] sm:$0xff]  ;;  %v1906_v4 = vld [vmem:[#allocation2 + $0x38] sm:$0xff] }
 0x484   :  { %v1850_v55 = vpop.eup %1849  ;;  %v1407_v14 = vmul.f32 %v2800_v58, %v1371_v2  ;;  %1859 = vrsqrt.f32 %v1310_v32  ;;  %v1315_v22 = vadd.f32 1e-05, %v1283_v31  ;;  %v1284_v41 = vmul.f32 0.0078125, %v1236_v53 }
 0x485   :  { %1536 = vst [vmem:[#allocation8 + $0x18] sm:$0xff] %v1504_v8  ;;  %v1501_v12 = vmax.f32 %v1469_v25, 0.0  ;;  %v1470_v11 = vadd.f32 %v1904_v1, %v1438_v3  ;;  %v1408_v51 = vmul.f32 %v2800_v58, %v1372_v36  ;;  %v1369_v9 = vmul.f32 %v1850_v55, %v2666_v21  ;;  %v1230_v26 = vpop.xlane.xlu0 %1229  ;;  %v1907_v3 = vld [vmem:[#allocation2 + $0x20] sm:$0xff] }
 0x486   :  { %v1852_v43 = vpop.eup %1851  ;;  %v1443_v15 = vadd.f32 %v2806_v44, %v1407_v14  ;;  %1861 = vrsqrt.f32 %v1315_v22  ;;  %v1316_v45 = vadd.f32 1e-05, %v1284_v41  ;;  %v1281_v7 = vmul.f32 0.0078125, %v1230_v26 }
 0x487   :  { %1533 = vst [vmem:[#allocation8] sm:$0xff] %v1501_v12  ;;  %v1502_v50 = vmax.f32 %v1470_v11, 0.0  ;;  %v1444_v54 = vadd.f32 %v2806_v44, %v1408_v51  ;;  %v1405_v16 = vmul.f32 %v2800_v58, %v1369_v9  ;;  %v1370_v30 = vmul.f32 %v1852_v43, %v2671_v28  ;;  %v1232_v5 = vpop.xlane.xlu1 %1231  ;;  %v1908_v11 = vld [vmem:[#allocation2 + $0x28] sm:$0xff] }
 0x488   :  { %v1854_v29 = vpop.eup %1853  ;;  %v1475_v59 = vadd.f32 %v1905_v27, %v1443_v15  ;;  %1863 = vrsqrt.f32 %v1316_v45  ;;  %v1313_v21 = vadd.f32 1e-05, %v1281_v7  ;;  %v1282_v19 = vmul.f32 0.0078125, %v1232_v5 }
 0x489   :  { %1534 = vst [vmem:[#allocation8 + $0x8] sm:$0xff] %v1502_v50  ;;  %v1476_v57 = vadd.f32 %v1906_v4, %v1444_v54  ;;  %v1441_v62 = vadd.f32 %v2806_v44, %v1405_v16  ;;  %v1406_v48 = vmul.f32 %v2800_v58, %v1370_v30  ;;  %v1375_v2 = vmul.f32 %v1854_v29, %v2676_v18  ;;  %v1242_v32 = vpop.xlane.xlu0 %1241  ;;  %v1909_v54 = vld [vmem:[#allocation2 + $0x50] sm:$0xff] }
 0x48a   :  { %v1856_v31 = vpop.eup %1855  ;;  %v1507_v8 = vmax.f32 %v1475_v59, 0.0  ;;  %1865 = vrsqrt.f32 %v1313_v21  ;;  %v1314_v28 = vadd.f32 1e-05, %v1282_v19  ;;  %v1287_v63 = vmul.f32 0.0078125, %v1242_v32  ;;  %v1910_v32 = vld [vmem:[#allocation2 + $0x58] sm:$0xff] }
 0x48b   :  { %v1508_v25 = vmax.f32 %v1476_v57, 0.0  ;;  %v1473_v36 = vadd.f32 %v1907_v3, %v1441_v62  ;;  %v1442_v53 = vadd.f32 %v2806_v44, %v1406_v48  ;;  %v1411_v55 = vmul.f32 %v2800_v58, %v1375_v2  ;;  %v1244_v14 = vpop.xlane.xlu1 %1243 }
 0x48c   :  { %v1858_v22 = vpop.eup %1857  ;;  %1539 = vst [vmem:[#allocation8 + $0x30] sm:$0xff] %v1507_v8  ;;  %v1376_v41 = vmul.f32 %v1856_v31, %v2681_v33  ;;  %1867 = vrsqrt.f32 %v1314_v28  ;;  %v1319_v18 = vadd.f32 1e-05, %v1287_v63  ;;  %v1288_v12 = vmul.f32 0.0078125, %v1244_v14  ;;  %v1911_v28 = vld [vmem:[#allocation2 + $0x40] sm:$0xff] }
 0x48d   :  { %1540 = vst [vmem:[#allocation8 + $0x38] sm:$0xff] %v1508_v25  ;;  %v1505_v1 = vmax.f32 %v1473_v36, 0.0  ;;  %v1474_v51 = vadd.f32 %v1908_v11, %v1442_v53  ;;  %v1447_v9 = vadd.f32 %v2806_v44, %v1411_v55  ;;  %v1373_v26 = vmul.f32 %v1858_v22, %v2686_v20  ;;  %v1238_v43 = vpop.xlane.xlu0 %1237 }
 0x48e   :  { %v1860_v15 = vpop.eup %1859  ;;  %v1412_v45 = vmul.f32 %v2800_v58, %v1376_v41  ;;  %1869 = vrsqrt.f32 %v1319_v18  ;;  %v1320_v7 = vadd.f32 1e-05, %v1288_v12  ;;  %v1285_v50 = vmul.f32 0.0078125, %v1238_v43  ;;  %v1912_v18 = vld [vmem:[#allocation2 + $0x48] sm:$0xff] }
 0x48f   :  { %1537 = vst [vmem:[#allocation8 + $0x20] sm:$0xff] %v1505_v1  ;;  %v1506_v33 = vmax.f32 %v1474_v51, 0.0  ;;  %v1479_v16 = vadd.f32 %v1909_v54, %v1447_v9  ;;  %v1409_v30 = vmul.f32 %v2800_v58, %v1373_v26  ;;  %v1374_v5 = vmul.f32 %v1860_v15, %v2691_v23  ;;  %v1240_v29 = vpop.xlane.xlu1 %1239 }
 0x490   :  { %v1862_v27 = vpop.eup %1861  ;;  %v1448_v59 = vadd.f32 %v2806_v44, %v1412_v45  ;;  %1871 = vrsqrt.f32 %v1320_v7  ;;  %v1317_v20 = vadd.f32 1e-05, %v1285_v50  ;;  %v1286_v21 = vmul.f32 0.0078125, %v1240_v29  ;;  %v1913_v45 = vld [vmem:[#allocation2 + $0x70] sm:$0xff] }
 0x491   :  { %1538 = vst [vmem:[#allocation8 + $0x28] sm:$0xff] %v1506_v33  ;;  %v1511_v19 = vmax.f32 %v1479_v16, 0.0  ;;  %v1445_v4 = vadd.f32 %v2806_v44, %v1409_v30  ;;  %v1410_v57 = vmul.f32 %v2800_v58, %v1374_v5  ;;  %v1379_v62 = vmul.f32 %v1862_v27, %v2696_v61  ;;  %v1250_v48 = vpop.xlane.xlu0 %1249  ;;  %v1914_v27 = vld [vmem:[#allocation2 + $0x78] sm:$0xff] }
 0x492   :  { %v1864_v2 = vpop.eup %1863  ;;  %v1480_v31 = vadd.f32 %v1910_v32, %v1448_v59  ;;  %1873 = vrsqrt.f32 %v1317_v20  ;;  %v1318_v23 = vadd.f32 1e-05, %v1286_v21  ;;  %v1291_v8 = vmul.f32 0.0078125, %v1250_v48 }
 0x493   :  { %1543 = vst [vmem:[#allocation8 + $0x50] sm:$0xff] %v1511_v19  ;;  %v1477_v63 = vadd.f32 %v1911_v28, %v1445_v4  ;;  %v1446_v25 = vadd.f32 %v2806_v44, %v1410_v57  ;;  %v1415_v3 = vmul.f32 %v2800_v58, %v1379_v62  ;;  %v1380_v36 = vmul.f32 %v1864_v2, %v2701_v46  ;;  %v1252_v53 = vpop.xlane.xlu1 %1251  ;;  %v1915_v28 = vld [vmem:[#allocation2 + $0x60] sm:$0xff] }
 0x494   :  { %v1866_v55 = vpop.eup %1865  ;;  %v1512_v14 = vmax.f32 %v1480_v31, 0.0  ;;  %1875 = vrsqrt.f32 %v1318_v23  ;;  %v1323_v61 = vadd.f32 1e-05, %v1291_v8  ;;  %v1292_v22 = vmul.f32 0.0078125, %v1252_v53 }
 0x495   :  { %v1509_v41 = vmax.f32 %v1477_v63, 0.0  ;;  %v1478_v12 = vadd.f32 %v1912_v18, %v1446_v25  ;;  %v1451_v1 = vadd.f32 %v2806_v44, %v1415_v3  ;;  %v1416_v11 = vmul.f32 %v2800_v58, %v1380_v36  ;;  %v1246_v51 = vpop.xlane.xlu0 %1245  ;;  %v1916_v3 = vld [vmem:[#allocation2 + $0x68] sm:$0xff] }
 0x496   :  { %v1868_v9 = vpop.eup %1867  ;;  %1544 = vst [vmem:[#allocation8 + $0x58] sm:$0xff] %v1512_v14  ;;  %v1377_v26 = vmul.f32 %v1866_v55, %v2706_v34  ;;  %1877 = vrsqrt.f32 %v1323_v61  ;;  %v1324_v46 = vadd.f32 1e-05, %v1292_v22  ;;  %v1289_v43 = vmul.f32 0.0078125, %v1246_v51 }
 0x497   :  { %1541 = vst [vmem:[#allocation8 + $0x40] sm:$0xff] %v1509_v41  ;;  %v1510_v15 = vmax.f32 %v1478_v12, 0.0  ;;  %v1483_v7 = vadd.f32 %v1913_v45, %v1451_v1  ;;  %v1452_v50 = vadd.f32 %v2806_v44, %v1416_v11  ;;  %v1378_v33 = vmul.f32 %v1868_v9, %v2711_v42  ;;  %v1248_v54 = vpop.xlane.xlu1 %1247  ;;  %v1917_v1 = vld [vmem:[#allocation2 + $0x90] sm:$0xff] }
 0x498   :  { %v1870_v16 = vpop.eup %1869  ;;  %v1413_v30 = vmul.f32 %v2800_v58, %v1377_v26  ;;  %1879 = vrsqrt.f32 %v1324_v46  ;;  %v1321_v5 = vadd.f32 1e-05, %v1289_v43  ;;  %v1290_v29 = vmul.f32 0.0078125, %v1248_v54 }
 0x499   :  { %1542 = vst [vmem:[#allocation8 + $0x48] sm:$0xff] %v1510_v15  ;;  %v1515_v34 = vmax.f32 %v1483_v7, 0.0  ;;  %v1484_v59 = vadd.f32 %v1914_v27, %v1452_v50  ;;  %v1414_v20 = vmul.f32 %v2800_v58, %v1378_v33  ;;  %v1383_v21 = vmul.f32 %v1870_v16, %v2716_v35  ;;  %v1258_v19 = vpop.xlane.xlu0 %1257  ;;  %v1918_v7 = vld [vmem:[#allocation2 + $0x98] sm:$0xff] }
 0x49a   :  { %v1872_v4 = vpop.eup %1871  ;;  %v1449_v57 = vadd.f32 %v2806_v44, %v1413_v30  ;;  %1881 = vrsqrt.f32 %v1321_v5  ;;  %v1322_v42 = vadd.f32 1e-05, %v1290_v29  ;;  %v1295_v62 = vmul.f32 0.0078125, %v1258_v19 }
 0x49b   :  { %1547 = vst [vmem:[#allocation8 + $0x70] sm:$0xff] %v1515_v34  ;;  %v1516_v48 = vmax.f32 %v1484_v59, 0.0  ;;  %v1450_v2 = vadd.f32 %v2806_v44, %v1414_v20  ;;  %v1419_v32 = vmul.f32 %v2800_v58, %v1383_v21  ;;  %v1384_v31 = vmul.f32 %v1872_v4, %v2721_v49  ;;  %v1260_v23 = vpop.xlane.xlu1 %1259 }
 0x49c   :  { %v1874_v8 = vpop.eup %1873  ;;  %v1481_v63 = vadd.f32 %v1915_v28, %v1449_v57  ;;  %1883 = vrsqrt.f32 %v1322_v42  ;;  %v1327_v35 = vadd.f32 1e-05, %v1295_v62  ;;  %v1296_v25 = vmul.f32 0.0078125, %v1260_v23  ;;  %v1921_v28 = vld [vmem:[#allocation2 + $0xb0] sm:$0xff] }
 0x49d   :  { %1548 = vst [vmem:[#allocation8 + $0x78] sm:$0xff] %v1516_v48  ;;  %v1482_v36 = vadd.f32 %v1916_v3, %v1450_v2  ;;  %v1455_v53 = vadd.f32 %v2806_v44, %v1419_v32  ;;  %v1420_v55 = vmul.f32 %v2800_v58, %v1384_v31  ;;  %v1381_v14 = vmul.f32 %v1874_v8, %v2726_v37  ;;  %v1254_v61 = vpop.xlane.xlu0 %1253  ;;  %v1920_v32 = vld [vmem:[#allocation2 + $0x88] sm:$0xff] }
 0x49e   :  { %v1876_v22 = vpop.eup %1875  ;;  %v1513_v41 = vmax.f32 %v1481_v63, 0.0  ;;  %1885 = vrsqrt.f32 %v1327_v35  ;;  %v1328_v49 = vadd.f32 1e-05, %v1296_v25  ;;  %v1293_v18 = vmul.f32 0.0078125, %v1254_v61 }
 0x49f   :  { %v1514_v12 = vmax.f32 %v1482_v36, 0.0  ;;  %v1487_v11 = vadd.f32 %v1917_v1, %v1455_v53  ;;  %v1456_v51 = vadd.f32 %v2806_v44, %v1420_v55  ;;  %v1417_v9 = vmul.f32 %v2800_v58, %v1381_v14  ;;  %v1256_v26 = vpop.xlane.xlu1 %1255 }
 0x4a0   :  { %v1878_v46 = vpop.eup %1877  ;;  %1545 = vst [vmem:[#allocation8 + $0x60] sm:$0xff] %v1513_v41  ;;  %v1382_v43 = vmul.f32 %v1876_v22, %v2731_v13  ;;  %1887 = vrsqrt.f32 %v1328_v49  ;;  %v1325_v37 = vadd.f32 1e-05, %v1293_v18  ;;  %v1294_v15 = vmul.f32 0.0078125, %v1256_v26  ;;  %v1919_v13 = vld [vmem:[#allocation2 + $0x80] sm:$0xff]  ;;  %v1922_v22 = vld [vmem:[#allocation2 + $0xb8] sm:$0xff] }
 0x4a1   :  { %1546 = vst [vmem:[#allocation8 + $0x68] sm:$0xff] %v1514_v12  ;;  %v1519_v45 = vmax.f32 %v1487_v11, 0.0  ;;  %v1488_v50 = vadd.f32 %v1918_v7, %v1456_v51  ;;  %v1453_v33 = vadd.f32 %v2806_v44, %v1417_v9  ;;  %v1387_v54 = vmul.f32 %v1878_v46, %v2736_v52  ;;  %v1923_v9 = vld [vmem:[#allocation2 + $0xa0] sm:$0xff] }
 0x4a2   :  { %v1880_v16 = vpop.eup %1879  ;;  %v1418_v30 = vmul.f32 %v2800_v58, %v1382_v43  ;;  %1889 = vrsqrt.f32 %v1325_v37  ;;  %v1326_v5 = vadd.f32 1e-05, %v1294_v15  ;;  %v1262_v29 = vpop.xlane.xlu0 %1261 }
 0x4a3   :  { %1551 = vst [vmem:[#allocation8 + $0x90] sm:$0xff] %v1519_v45  ;;  %v1520_v34 = vmax.f32 %v1488_v50, 0.0  ;;  %v1485_v27 = vadd.f32 %v1919_v13, %v1453_v33  ;;  %v1423_v59 = vmul.f32 %v2800_v58, %v1387_v54  ;;  %v1388_v20 = vmul.f32 %v1880_v16, %v2741_v38  ;;  %v1924_v50 = vld [vmem:[#allocation2 + $0xa8] sm:$0xff]  ;;  %v1925_v13 = vld [vmem:[#allocation2 + $0xd0] sm:$0xff] }
 0x4a4   :  { %v1882_v21 = vpop.eup %1881  ;;  %v1454_v19 = vadd.f32 %v2806_v44, %v1418_v30  ;;  %1891 = vrsqrt.f32 %v1326_v5  ;;  %v1297_v4 = vmul.f32 0.0078125, %v1262_v29  ;;  %v1264_v52 = vpop.xlane.xlu1 %1263 }
 0x4a5   :  { %1552 = vst [vmem:[#allocation8 + $0x98] sm:$0xff] %v1520_v34  ;;  %v1517_v57 = vmax.f32 %v1485_v27, 0.0  ;;  %v1459_v42 = vadd.f32 %v2806_v44, %v1423_v59  ;;  %v1424_v62 = vmul.f32 %v2800_v58, %v1388_v20  ;;  %v1385_v48 = vmul.f32 %v1882_v21, %v2746_v39  ;;  %v1926_v59 = vld [vmem:[#allocation2 + $0xd8] sm:$0xff] }
 0x4a6   :  { %v1884_v2 = vpop.eup %1883  ;;  %v1486_v31 = vadd.f32 %v1920_v32, %v1454_v19  ;;  %v1329_v23 = vadd.f32 1e-05, %v1297_v4  ;;  %v1298_v8 = vmul.f32 0.0078125, %v1264_v52  ;;  %v1266_v38 = vpop.xlane.xlu0 %1265  ;;  %v1928_v32 = vld [vmem:[#allocation2 + $0xc8] sm:$0xff] }
 0x4a7   :  { %1549 = vst [vmem:[#allocation8 + $0x80] sm:$0xff] %v1517_v57  ;;  %v1491_v63 = vadd.f32 %v1921_v28, %v1459_v42  ;;  %v1460_v35 = vadd.f32 %v2806_v44, %v1424_v62  ;;  %v1421_v25 = vmul.f32 %v2800_v58, %v1385_v48  ;;  %v1386_v3 = vmul.f32 %v1884_v2, %v2751_v56  ;;  %v1927_v57 = vld [vmem:[#allocation2 + $0xc0] sm:$0xff] }
 0x4a8   :  { %v1886_v36 = vpop.eup %1885  ;;  %v1518_v53 = vmax.f32 %v1486_v31, 0.0  ;;  %1893 = vrsqrt.f32 %v1329_v23  ;;  %v1330_v55 = vadd.f32 1e-05, %v1298_v8  ;;  %v1299_v39 = vmul.f32 0.0078125, %v1266_v38  ;;  %v1268_v14 = vpop.xlane.xlu1 %1267 }
 0x4a9   :  { %v1523_v61 = vmax.f32 %v1491_v63, 0.0  ;;  %v1492_v41 = vadd.f32 %v1922_v22, %v1460_v35  ;;  %v1457_v49 = vadd.f32 %v2806_v44, %v1421_v25  ;;  %v1422_v18 = vmul.f32 %v2800_v58, %v1386_v3  ;;  %v1929_v3 = vld [vmem:[#allocation2 + $0xe0] sm:$0xff] }
 0x4aa   :  { %v1888_v12 = vpop.eup %1887  ;;  %1550 = vst [vmem:[#allocation8 + $0x88] sm:$0xff] %v1518_v53  ;;  %v1391_v1 = vmul.f32 %v1886_v36, %v2756_v24  ;;  %1895 = vrsqrt.f32 %v1330_v55  ;;  %v1331_v11 = vadd.f32 1e-05, %v1299_v39  ;;  %v1300_v56 = vmul.f32 0.0078125, %v1268_v14  ;;  %v1930_v14 = vld [vmem:[#allocation2 + $0xe8] sm:$0xff] }
 0x4ab   :  { %1555 = vst [vmem:[#allocation8 + $0xb0] sm:$0xff] %v1523_v61  ;;  %v1524_v51 = vmax.f32 %v1492_v41, 0.0  ;;  %v1489_v26 = vadd.f32 %v1923_v9, %v1457_v49  ;;  %v1458_v46 = vadd.f32 %v2806_v44, %v1422_v18  ;;  %v1392_v43 = vmul.f32 %v1888_v12, %v2761_v47 }
 0x4ac   :  { %v1890_v37 = vpop.eup %1889  ;;  %v1427_v15 = vmul.f32 %v2800_v58, %v1391_v1  ;;  %1897 = vrsqrt.f32 %v1331_v11  ;;  %v1332_v45 = vadd.f32 1e-05, %v1300_v56  ;;  %v1932_v11 = vld [vmem:[#allocation2 + $0xf8] sm:$0xff] }
 0x4ad   :  { %1556 = vst [vmem:[#allocation8 + $0xb8] sm:$0xff] %v1524_v51  ;;  %v1521_v7 = vmax.f32 %v1489_v26, 0.0  ;;  %v1490_v24 = vadd.f32 %v1924_v50, %v1458_v46  ;;  %v1428_v33 = vmul.f32 %v2800_v58, %v1392_v43  ;;  %v1389_v54 = vmul.f32 %v1890_v37, %v2766_v10 }
 0x4ae   :  { %v1892_v16 = vpop.eup %1891  ;;  %v1463_v30 = vadd.f32 %v2806_v44, %v1427_v15  ;;  %1899 = vrsqrt.f32 %v1332_v45 }
 0x4af   :  { %1553 = vst [vmem:[#allocation8 + $0xa0] sm:$0xff] %v1521_v7  ;;  %v1522_v5 = vmax.f32 %v1490_v24, 0.0  ;;  %v1464_v47 = vadd.f32 %v2806_v44, %v1428_v33  ;;  %v1425_v29 = vmul.f32 %v2800_v58, %v1389_v54  ;;  %v1390_v34 = vmul.f32 %v1892_v16, %v2771_v0 }
 0x4b0   :  { %v1495_v27 = vadd.f32 %v1925_v13, %v1463_v30 }
 0x4b1   :  { %1554 = vst [vmem:[#allocation8 + $0xa8] sm:$0xff] %v1522_v5  ;;  %v1496_v20 = vadd.f32 %v1926_v59, %v1464_v47  ;;  %v1461_v21 = vadd.f32 %v2806_v44, %v1425_v29  ;;  %v1426_v10 = vmul.f32 %v2800_v58, %v1390_v34 }
 0x4b2   :  { %v1894_v19 = vpop.eup %1893  ;;  %v1527_v4 = vmax.f32 %v1495_v27, 0.0 }
 0x4b3   :  { %v1528_v52 = vmax.f32 %v1496_v20, 0.0  ;;  %v1493_v42 = vadd.f32 %v1927_v57, %v1461_v21  ;;  %v1462_v62 = vadd.f32 %v2806_v44, %v1426_v10  ;;  %v1393_v48 = vmul.f32 %v1894_v19, %v2778_v40 }
 0x4b4   :  { %v1896_v2 = vpop.eup %1895  ;;  %1559 = vst [vmem:[#allocation8 + $0xd0] sm:$0xff] %v1527_v4 }
 0x4b5   :  { %1560 = vst [vmem:[#allocation8 + $0xd8] sm:$0xff] %v1528_v52  ;;  %v1525_v0 = vmax.f32 %v1493_v42, 0.0  ;;  %v1494_v31 = vadd.f32 %v1928_v32, %v1462_v62  ;;  %v1429_v23 = vmul.f32 %v2800_v58, %v1393_v48  ;;  %v1394_v8 = vmul.f32 %v1896_v2, %v2781_v17 }
 0x4b6   :  { %v1898_v38 = vpop.eup %1897 }
 0x4b7   :  { %1557 = vst [vmem:[#allocation8 + $0xc0] sm:$0xff] %v1525_v0  ;;  %v1526_v28 = vmax.f32 %v1494_v31, 0.0  ;;  %v1465_v63 = vadd.f32 %v2806_v44, %v1429_v23  ;;  %v1430_v35 = vmul.f32 %v2800_v58, %v1394_v8  ;;  %v1395_v25 = vmul.f32 %v1898_v38, %v2786_v60  ;;  %v1931_v60 = vld [vmem:[#allocation2 + $0xf0] sm:$0xff] }
 0x4b8   :  { %v1900_v40 = vpop.eup %1899 }
 0x4b9   :  { %1558 = vst [vmem:[#allocation8 + $0xc8] sm:$0xff] %v1526_v28  ;;  %v1497_v36 = vadd.f32 %v1929_v3, %v1465_v63  ;;  %v1466_v53 = vadd.f32 %v2806_v44, %v1430_v35  ;;  %v1431_v55 = vmul.f32 %v2800_v58, %v1395_v25  ;;  %v1396_v39 = vmul.f32 %v1900_v40, %v2791_v6 }
 0x4bb   :  { %v1529_v17 = vmax.f32 %v1497_v36, 0.0  ;;  %v1498_v61 = vadd.f32 %v1930_v14, %v1466_v53  ;;  %v1467_v22 = vadd.f32 %v2806_v44, %v1431_v55  ;;  %v1432_v41 = vmul.f32 %v2800_v58, %v1396_v39 }
 0x4bd   :  { %1561 = vst [vmem:[#allocation8 + $0xe0] sm:$0xff] %v1529_v17  ;;  %v1530_v49 = vmax.f32 %v1498_v61, 0.0  ;;  %v1499_v18 = vadd.f32 %v1931_v60, %v1467_v22  ;;  %v1468_v12 = vadd.f32 %v2806_v44, %v1432_v41 }
 0x4bf   :  { %1562 = vst [vmem:[#allocation8 + $0xe8] sm:$0xff] %v1530_v49  ;;  %v1531_v1 = vmax.f32 %v1499_v18, 0.0  ;;  %v1500_v56 = vadd.f32 %v1932_v11, %v1468_v12 }
 0x4c1   :  { %1563 = vst [vmem:[#allocation8 + $0xf0] sm:$0xff] %v1531_v1  ;;  %v1532_v6 = vmax.f32 %v1500_v56, 0.0 }
 0x4c3   :  { %1564 = vst [vmem:[#allocation8 + $0xf8] sm:$0xff] %v1532_v6 }
 0x4c4   :  { %2010 = shalt.err (!%p2007_p0)
}
 0x4c5   :  { %s2011_s17 = scalar_lea.hbm %s2922_s4, 4096 }
 0x4c6   :  { %p2012_p1 = scmp.ne.s32.totalorder %s2922_s4, %s2011_s17  ;;  %p2015_p2 = scmp.lt.u32.totalorder %s2011_s17, %s2922_s4 }
 0x4c8   :  { %p2017_p3 = pnand %p2015_p2, %p2012_p1 }
 0x4ca   :  { %2020 = shalt.err (!%p2017_p3)
}
 0x4cb   :  { %1576 = dma.vmem_to_hbm [thread:$0]  %s1571_s12, 4096, %s2922_s4, [#allocation4], %s2031_s1, %s2031_s1, %s2032_s13  }
 0x4cc   :  { %2025 = dma.done.wait [#allocation4], 4096  }
 0x4cd   :  { %2026 = vsyncadd [#allocation4], 4294963200 }
 0x4ce   :  { %1580 = vsyncpa [#allocation3], 1 }
 0x4cf   :  { %1581 = vsyncpa [#allocation6], 1 }
 0x4d0   :  { %1582 = vsyncpa [#allocation4], 1 }

</bundles_post_ra>
